<compile_context>
chip_gen: v6e
topology: v6e:2x2x1
jax: 0.10.0
libtpu: 0.0.40
codegen_flags: <defaults>
</compile_context>

<pallas_src>
import jax
import jax.numpy as jnp
from jax import lax
from jax.experimental import pallas as pl
from jax.experimental.pallas import tpu as pltpu

_SUB = 128  # lane width of one score sub-tile (one f32 vreg lane extent)


def _use_bf16_exp():
    """bf16 exp only where the EUP/VPU handle bf16 natively (v6e / v7x)."""
    try:
        kind = jax.devices()[0].device_kind.lower()
    except Exception:
        return False
    return any(tag in kind for tag in ("v6", "v7", "6e", "7x"))


def _pick_tile(n_padded, max_tile=512, sub=_SUB):
    """Largest multiple of `sub` that is <= max_tile and divides n_padded."""
    t = (min(max_tile, n_padded) // sub) * sub
    while t > sub and n_padded % t != 0:
        t -= sub
    return max(t, sub)


def _make_kernel(*, tq, tkv, n_valid, use_bf16_exp, needs_mask):
    n_q_sub = tq // _SUB
    n_kv_sub = tkv // _SUB

    def kernel(x_q_ref, x_kv_ref, wq_ref, wkv_ref, wout_ref, o_ref,
               thqc_ref, acc_ref, m_ref, l_ref):
        """One (batch, q_block, kv_block) grid step.  N lives on the lane axis everywhere.

          x_q_ref  : (1, C, TQ)  f32   query block of x (resident across kv steps)
          x_kv_ref : (1, C, TKV) bf16  key/value block of x (re-streamed -> half bytes)
          wq_ref   : (KP, C) f32  rows [IC:2IC] = (wt - mean(wt, 0)) / IC, else 0
          wkv_ref  : (KP, C) f32  rows [0:IC] = wg, rows [IC:2IC] = wt, else 0
          wout_ref : (C, KP) f32  cols [0:IC] = ww, else 0
          o_ref    : (1, C, TQ)  lane-dense output block
          thqc_ref : (KP, TQ) centered+scaled theta of the q block (scratch)
          acc_ref  : (KP, TQ) online-softmax numerator accumulator (scratch)
          m_ref    : (1, TQ) running row max;  l_ref : (1, TQ) running row sum
        """
        ki = pl.program_id(2)

        @pl.when(ki == 0)
        def _init():
            # q-side projection; count_cov_second's centering and 1/IC scale are already
            # folded into wq in the wrapper, so no in-kernel mean reduce.
            thqc_ref[...] = jnp.dot(wq_ref[...], x_q_ref[0],
                                    preferred_element_type=jnp.float32)
            m_ref[...] = jnp.full_like(m_ref, -jnp.inf)
            l_ref[...] = jnp.zeros_like(l_ref)
            acc_ref[...] = jnp.zeros_like(acc_ref)

        # Fused g|theta projection of the WHOLE kv block, once per grid step, reused by
        # every q sub-chunk: (KP, C) @ (C, TKV) -> (KP, TKV), f32 accumulate.  The bf16 kv
        # stream is upcast here (a handful of VPU converts) so the matmul shapes/dtypes
        # match the previously validated f32 path.
        gt_full = jnp.dot(wkv_ref[...], x_kv_ref[0].astype(jnp.float32),
                          preferred_element_type=jnp.float32)
        gt_full_b = gt_full.astype(jnp.bfloat16)  # MXU operand for the aggregation dot

        # kv-outer / q-inner sweep over 128-wide sub-chunks.  Live score tile stays at
        # (128, 128); per-grid-step overhead is amortized over n_kv_sub * n_q_sub tiles.
        for c in range(n_kv_sub):
            kv_lo = c * _SUB
            gt = gt_full[:, kv_lo:kv_lo + _SUB]        # (KP, SUB) f32
            gt_b = gt_full_b[:, kv_lo:kv_lo + _SUB]    # (KP, SUB) bf16
            if needs_mask:
                # Global kv position of each sublane row of the score tile; padded kv
                # columns (>= n_valid) are pushed to a huge negative before the softmax.
                kv_ids = (ki * tkv + kv_lo
                          + lax.broadcasted_iota(jnp.int32, (_SUB, _SUB), 0))
                kv_valid = kv_ids < n_valid
            for qc in range(n_q_sub):
                q_lo = qc * _SUB
                th = thqc_ref[:, q_lo:q_lo + _SUB]     # (KP, SUB) f32, static ref slice
                # Transposed score tile: s_t[m, n] = f[n, m]; contraction over the padded
                # channel axis KP (the g rows of gt hit zero rows of thqc).
                s_t = lax.dot_general(gt, th, (((0,), (0,)), ((), ())),
                                      preferred_element_type=jnp.float32)  # (SUB, SUB)
                if needs_mask:
                    s_t = jnp.where(kv_valid, s_t, -1e30)

                # Online softmax over the kv (sublane) axis; per-query stats stay on lanes.
                m_old = m_ref[:, q_lo:q_lo + _SUB]
                m_new = jnp.maximum(m_old, jnp.max(s_t, axis=0, keepdims=True))
                alpha = jnp.exp(m_old - m_new)                              # (1, SUB)
                if use_bf16_exp:
                    # v6e/v7x: bf16 EUP exp (~2x) and half the p_t vreg footprint.
                    p_t_b = jnp.exp((s_t - m_new).astype(jnp.bfloat16))     # (SUB, SUB)
                    p_sum = jnp.sum(p_t_b.astype(jnp.float32), axis=0, keepdims=True)
                else:
                    # v5e has no bf16 EUP/VPU: keep the exp path in f32.
                    p_t = jnp.exp(s_t - m_new)
                    p_sum = jnp.sum(p_t, axis=0, keepdims=True)
                    p_t_b = p_t.astype(jnp.bfloat16)
                l_ref[:, q_lo:q_lo + _SUB] = alpha * l_ref[:, q_lo:q_lo + _SUB] + p_sum
                # Aggregate: rows [0:IC] of acc accumulate y^T = g_kv @ p^T; the theta/pad
                # rows are dead weight, zeroed later by wout's zero columns.  bf16 MXU
                # inputs, f32 accumulate, f32 running stats.
                acc_ref[:, q_lo:q_lo + _SUB] = (
                    alpha * acc_ref[:, q_lo:q_lo + _SUB]
                    + jnp.dot(gt_b, p_t_b, preferred_element_type=jnp.float32))
                m_ref[:, q_lo:q_lo + _SUB] = m_new

        @pl.when(ki == pl.num_programs(2) - 1)
        def _finalize():
            # Exact reciprocal: runs once per q block, so approx buys nothing.
            inv_l = pl.reciprocal(l_ref[...], approx=False)
            y_t = acc_ref[...] * inv_l                                     # (KP, TQ)
            w_y = jnp.dot(wout_ref[...], y_t, preferred_element_type=jnp.float32)
            o_ref[0] = (w_y + x_q_ref[0]).astype(o_ref.dtype)              # lane-dense

    return kernel


def nonlocal_block_2d(x_nchw, wg, wt, ww, *, max_tile=512):
    """x_nchw: (B, C, H, W) f32; wg/wt: (IC, C) 1x1 conv weights; ww: (C, IC)."""
    B, C, H, W = x_nchw.shape
    N = H * W
    IC = wg.shape[0]

    # Pad N up to a multiple of 128 (instead of collapsing to a single (1,C,N) block):
    # keeps lane-dense 128-multiple tiles and >=2 blocks on the parallel grid axes.
    NP = -(-N // _SUB) * _SUB
    needs_mask = NP != N
    tq = _pick_tile(NP, max_tile)
    tkv = _pick_tile(NP, max_tile)

    # Keep N on the minor (lane) axis: plain reshape, no HBM transpose passes.
    x = x_nchw.reshape(B, C, N)
    if needs_mask:
        x = jnp.pad(x, ((0, 0), (0, 0), (0, NP - N)))
    x_q = x                              # f32: exact residual add + precise theta_q
    x_kv = x.astype(jnp.bfloat16)        # bf16: halves the (dominant) re-streamed kv bytes

    # Pad the tiny projection dim (2*IC) up to a multiple of 8 sublanes; zero rows/cols
    # are mathematically inert.
    kp = max(8, -(-2 * IC // 8) * 8)
    w_kv = jnp.zeros((kp, C), jnp.float32).at[:IC].set(wg).at[IC:2 * IC].set(wt)
    # Fold count_cov_second's per-pixel centering and 1/IC scale into the q-side weight:
    # (theta[n] - mean_i theta[n]) / IC == ((wt - mean(wt, 0)) / IC) @ x[:, n].
    w_qc = (wt - jnp.mean(wt, axis=0, keepdims=True)) / IC
    w_q = jnp.zeros((kp, C), jnp.float32).at[IC:2 * IC].set(w_qc)
    w_out = jnp.zeros((C, kp), jnp.float32).at[:, :IC].set(ww)

    kernel = _make_kernel(tq=tq, tkv=tkv, n_valid=N,
                          use_bf16_exp=_use_bf16_exp(), needs_mask=needs_mask)

    grid = (B, NP // tq, NP // tkv)
    out = pl.pallas_call(
        kernel,
        out_shape=jax.ShapeDtypeStruct((B, C, NP), x_nchw.dtype),
        grid_spec=pltpu.PrefetchScalarGridSpec(
            num_scalar_prefetch=0,
            grid=grid,
            in_specs=[
                pl.BlockSpec((1, C, tq), lambda b, qi, ki: (b, 0, qi)),    # x (q block, f32)
                pl.BlockSpec((1, C, tkv), lambda b, qi, ki: (b, 0, ki)),   # x (kv block, bf16)
                pl.BlockSpec((kp, C), lambda b, qi, ki: (0, 0)),           # w_q
                pl.BlockSpec((kp, C), lambda b, qi, ki: (0, 0)),           # w_kv (g|theta)
                pl.BlockSpec((C, kp), lambda b, qi, ki: (0, 0)),           # w_out
            ],
            out_specs=pl.BlockSpec((1, C, tq), lambda b, qi, ki: (b, 0, qi)),
            scratch_shapes=[
                pltpu.VMEM((kp, tq), jnp.float32),   # theta_qc (centered + scaled)
                pltpu.VMEM((kp, tq), jnp.float32),   # online-softmax numerator accumulator
                pltpu.VMEM((1, tq), jnp.float32),    # running max
                pltpu.VMEM((1, tq), jnp.float32),    # running sum
            ],
        ),
        compiler_params=pltpu.CompilerParams(
            dimension_semantics=("parallel", "parallel", "arbitrary"),
            # Working set is <1 MiB; cap is sized against v7x (64 MiB physical VMEM).
            vmem_limit_bytes=32 * 1024 * 1024),
    )(x_q, x_kv, w_q, w_kv, w_out)

    if needs_mask:
        out = out[..., :N]
    return out.reshape(B, C, H, W)


def _reference(x, wg, wt, ww):
    """Pure-JAX replica of the PyTorch forward (NCHW)."""
    B, C, H, W = x.shape
    IC = wg.shape[0]
    xf = x.reshape(B, C, H * W)                               # (B, C, N)
    g_x = jnp.einsum('ic,bcn->bni', wg, xf)                   # (B, N, IC)
    theta = jnp.einsum('ic,bcn->bni', wt, xf)                 # (B, N, IC)
    mean = theta.mean(-1, keepdims=True)
    f = jnp.einsum('bni,bmi->bnm', theta - mean, theta) / IC  # (B, N, N)
    fdc = jax.nn.softmax(f, axis=-1)
    y = jnp.einsum('bnm,bmi->bni', fdc, g_x)                  # (B, N, IC)
    wy = jnp.einsum('ci,bni->bnc', ww, y)                     # (B, N, C)
    return jnp.transpose(wy, (0, 2, 1)).reshape(B, C, H, W) + x


if __name__ == "__main__":
    # in_channels=32, reduction=8 -> inter_channels=4; H=W=16 -> N=256 so the in-kernel
    # 2x2 sub-chunk sweep (kv-outer / q-inner online softmax) is actually exercised.
    B, C, H, W = 2, 32, 16, 16
    reduction = 8
    IC = C // reduction

    key = jax.random.PRNGKey(0)
    kx, kg, kt, kw, kx2 = jax.random.split(key, 5)

    x = jax.random.normal(kx, (B, C, H, W), dtype=jnp.float32)
    # NOTE: the PyTorch module zero-inits self.W; small random weights are used here so
    # the W-projection path is actually exercised.
    wg = 0.1 * jax.random.normal(kg, (IC, C), dtype=jnp.float32)   # g.weight[:, :, 0, 0]
    wt = 0.1 * jax.random.normal(kt, (IC, C), dtype=jnp.float32)   # theta.weight[:, :, 0, 0]
    ww = 0.1 * jax.random.normal(kw, (C, IC), dtype=jnp.float32)   # W.weight[:, :, 0, 0]

    z = jax.block_until_ready(nonlocal_block_2d(x, wg, wt, ww))
    z_ref = _reference(x, wg, wt, ww)
    assert z.shape == (B, C, H, W)
    # bf16 kv/aggregation (and bf16 exp on v6e/v7x) => slightly looser than pure f32.
    assert jnp.allclose(z, z_ref, atol=3e-3, rtol=3e-3), "mismatch vs reference (aligned N)"

    # Non-128-aligned spatial size: exercises the pad-to-128 + kv masking path.
    H2 = W2 = 10
    x2 = jax.random.normal(kx2, (B, C, H2, W2), dtype=jnp.float32)
    z2 = jax.block_until_ready(nonlocal_block_2d(x2, wg, wt, ww))
    z2_ref = _reference(x2, wg, wt, ww)
    assert jnp.allclose(z2, z2_ref, atol=3e-3, rtol=3e-3), "mismatch vs reference (padded N)"

    print("KERNEL_OK")
</pallas_src>

<mosaic_0001>
module attributes {stable_mosaic.version = 11 : i64} {
  func.func @kernel(%arg0: i32, %arg1: i32, %arg2: i32, %arg3: memref<1x32x256xf32, #tpu.memory_space<vmem>>, %arg4: memref<1x32x256xbf16, #tpu.memory_space<vmem>>, %arg5: memref<8x32xf32, #tpu.memory_space<vmem>>, %arg6: memref<8x32xf32, #tpu.memory_space<vmem>>, %arg7: memref<32x8xf32, #tpu.memory_space<vmem>>, %arg8: memref<1x32x256xf32, #tpu.memory_space<vmem>>, %arg9: memref<8x256xf32, #tpu.memory_space<vmem>>, %arg10: memref<8x256xf32, #tpu.memory_space<vmem>>, %arg11: memref<1x256xf32, #tpu.memory_space<vmem>>, %arg12: memref<1x256xf32, #tpu.memory_space<vmem>>) attributes {dimension_semantics = [#tpu.dimension_semantics<parallel>, #tpu.dimension_semantics<parallel>, #tpu.dimension_semantics<arbitrary>], iteration_bounds = array<i64: 2, 1, 1>, scalar_prefetch = 0 : i64, scratch_operands = 4 : i64, tpu.core_type = #tpu.core_type<tc>, window_params = [{transform_indices = @transform_0, window_bounds = array<i64: 1, 32, 256>}, {transform_indices = @transform_1, window_bounds = array<i64: 1, 32, 256>}, {pipeline_mode = #tpu.pipeline_mode<synchronous>, transform_indices = @transform_2, window_bounds = array<i64: 8, 32>}, {pipeline_mode = #tpu.pipeline_mode<synchronous>, transform_indices = @transform_3, window_bounds = array<i64: 8, 32>}, {pipeline_mode = #tpu.pipeline_mode<synchronous>, transform_indices = @transform_4, window_bounds = array<i64: 32, 8>}, {transform_indices = @transform_5, window_bounds = array<i64: 1, 32, 256>}]} {
    %c0_i32 = arith.constant 0 : i32
    %0 = arith.cmpi eq, %arg2, %c0_i32 : i32
    %1 = arith.extui %0 : i1 to i32
    %c0_i32_0 = arith.constant 0 : i32
    %2 = arith.cmpi ne, %1, %c0_i32_0 : i32
    scf.if %2 {
      %c0_78 = arith.constant 0 : index
      %c0_79 = arith.constant 0 : index
      %116 = vector.load %arg5[%c0_78, %c0_79] : memref<8x32xf32, #tpu.memory_space<vmem>>, vector<8x32xf32>
      %c0_80 = arith.constant 0 : index
      %c0_81 = arith.constant 0 : index
      %c0_82 = arith.constant 0 : index
      %117 = vector.load %arg3[%c0_80, %c0_81, %c0_82] : memref<1x32x256xf32, #tpu.memory_space<vmem>>, vector<1x32x256xf32>
      %118 = vector.shape_cast %117 : vector<1x32x256xf32> to vector<32x256xf32>
      %cst_83 = arith.constant dense<0.000000e+00> : vector<8x256xf32>
      %119 = tpu.matmul %116, %118, %cst_83 {dimension_numbers = #tpu.dot_dimension_numbers<[1], [0], [0], [1], [0, 0, 1, 1], [], []>} : vector<8x32xf32>, vector<32x256xf32>, vector<8x256xf32> -> vector<8x256xf32>
      %c0_84 = arith.constant 0 : index
      %c0_85 = arith.constant 0 : index
      %120 = vector.load %arg9[%c0_84, %c0_85] : memref<8x256xf32, #tpu.memory_space<vmem>>, vector<8x256xf32>
      tpu.vector_store %arg9[%c0_84, %c0_85], %119 {strides = array<i32>} : memref<8x256xf32, #tpu.memory_space<vmem>>, vector<8x256xf32>,
      %cst_86 = arith.constant 0xFF800000 : f32
      %121 = vector.broadcast %cst_86 : f32 to vector<1x256xf32>
      %c0_87 = arith.constant 0 : index
      %c0_88 = arith.constant 0 : index
      %122 = vector.load %arg11[%c0_87, %c0_88] : memref<1x256xf32, #tpu.memory_space<vmem>>, vector<1x256xf32>
      tpu.vector_store %arg11[%c0_87, %c0_88], %121 {strides = array<i32>} : memref<1x256xf32, #tpu.memory_space<vmem>>, vector<1x256xf32>,
      %cst_89 = arith.constant 0.000000e+00 : f32
      %123 = vector.broadcast %cst_89 : f32 to vector<1x256xf32>
      %c0_90 = arith.constant 0 : index
      %c0_91 = arith.constant 0 : index
      %124 = vector.load %arg12[%c0_90, %c0_91] : memref<1x256xf32, #tpu.memory_space<vmem>>, vector<1x256xf32>
      tpu.vector_store %arg12[%c0_90, %c0_91], %123 {strides = array<i32>} : memref<1x256xf32, #tpu.memory_space<vmem>>, vector<1x256xf32>,
      %cst_92 = arith.constant 0.000000e+00 : f32
      %125 = vector.broadcast %cst_92 : f32 to vector<8x256xf32>
      %c0_93 = arith.constant 0 : index
      %c0_94 = arith.constant 0 : index
      %126 = vector.load %arg10[%c0_93, %c0_94] : memref<8x256xf32, #tpu.memory_space<vmem>>, vector<8x256xf32>
      tpu.vector_store %arg10[%c0_93, %c0_94], %125 {strides = array<i32>} : memref<8x256xf32, #tpu.memory_space<vmem>>, vector<8x256xf32>,
    } else {
    }
    %c0 = arith.constant 0 : index
    %c0_1 = arith.constant 0 : index
    %3 = vector.load %arg6[%c0, %c0_1] : memref<8x32xf32, #tpu.memory_space<vmem>>, vector<8x32xf32>
    %c0_2 = arith.constant 0 : index
    %c0_3 = arith.constant 0 : index
    %c0_4 = arith.constant 0 : index
    %4 = vector.load %arg4[%c0_2, %c0_3, %c0_4] : memref<1x32x256xbf16, #tpu.memory_space<vmem>>, vector<1x32x256xbf16>
    %5 = vector.shape_cast %4 : vector<1x32x256xbf16> to vector<32x256xbf16>
    %6 = arith.extf %5 : vector<32x256xbf16> to vector<32x256xf32>
    %cst = arith.constant dense<0.000000e+00> : vector<8x256xf32>
    %7 = tpu.matmul %3, %6, %cst {dimension_numbers = #tpu.dot_dimension_numbers<[1], [0], [0], [1], [0, 0, 1, 1], [], []>} : vector<8x32xf32>, vector<32x256xf32>, vector<8x256xf32> -> vector<8x256xf32>
    %8 = arith.truncf %7 : vector<8x256xf32> to vector<8x256xbf16>
    %9 = vector.extract_strided_slice %7 {offsets = [0, 0], sizes = [8, 128], strides = [1, 1]} : vector<8x256xf32> to vector<8x128xf32>
    %10 = vector.extract_strided_slice %8 {offsets = [0, 0], sizes = [8, 128], strides = [1, 1]} : vector<8x256xbf16> to vector<8x128xbf16>
    %c0_5 = arith.constant 0 : index
    %c0_6 = arith.constant 0 : index
    %11 = vector.load %arg9[%c0_5, %c0_6] : memref<8x256xf32, #tpu.memory_space<vmem>>, vector<8x128xf32>
    %cst_7 = arith.constant dense<0.000000e+00> : vector<128x128xf32>
    %12 = tpu.matmul %9, %11, %cst_7 {dimension_numbers = #tpu.dot_dimension_numbers<[0], [0], [1], [1], [0, 1, 1, 1], [], []>} : vector<8x128xf32>, vector<8x128xf32>, vector<128x128xf32> -> vector<128x128xf32>
    %c0_8 = arith.constant 0 : index
    %c0_9 = arith.constant 0 : index
    %13 = vector.load %arg11[%c0_8, %c0_9] : memref<1x256xf32, #tpu.memory_space<vmem>>, vector<1x128xf32>
    %cst_10 = arith.constant dense<0xFF800000> : vector<128xf32>
    %14 = vector.multi_reduction <maximumf>, %12, %cst_10 [0] : vector<128x128xf32> to vector<128xf32>
    %15 = vector.shape_cast %14 : vector<128xf32> to vector<1x128xf32>
    %16 = arith.maximumf %13, %15 : vector<1x128xf32>
    %17 = arith.subf %13, %16 : vector<1x128xf32>
    %18 = math.exp %17 : vector<1x128xf32>
    %19 = vector.broadcast %16 : vector<1x128xf32> to vector<128x128xf32>
    %20 = arith.subf %12, %19 : vector<128x128xf32>
    %21 = math.exp %20 : vector<128x128xf32>
    %cst_11 = arith.constant dense<0.000000e+00> : vector<128xf32>
    %22 = vector.multi_reduction <add>, %21, %cst_11 [0] : vector<128x128xf32> to vector<128xf32>
    %23 = vector.shape_cast %22 : vector<128xf32> to vector<1x128xf32>
    %24 = arith.truncf %21 : vector<128x128xf32> to vector<128x128xbf16>
    %c0_12 = arith.constant 0 : index
    %c0_13 = arith.constant 0 : index
    %25 = vector.load %arg12[%c0_12, %c0_13] : memref<1x256xf32, #tpu.memory_space<vmem>>, vector<1x128xf32>
    %26 = arith.mulf %18, %25 : vector<1x128xf32>
    %27 = arith.addf %26, %23 : vector<1x128xf32>
    %c0_14 = arith.constant 0 : index
    %c0_15 = arith.constant 0 : index
    %28 = vector.load %arg12[%c0_14, %c0_15] : memref<1x256xf32, #tpu.memory_space<vmem>>, vector<1x128xf32>
    tpu.vector_store %arg12[%c0_14, %c0_15], %27 {strides = array<i32>} : memref<1x256xf32, #tpu.memory_space<vmem>>, vector<1x128xf32>,
    %c0_16 = arith.constant 0 : index
    %c0_17 = arith.constant 0 : index
    %29 = vector.load %arg10[%c0_16, %c0_17] : memref<8x256xf32, #tpu.memory_space<vmem>>, vector<8x128xf32>
    %30 = vector.broadcast %18 : vector<1x128xf32> to vector<8x128xf32>
    %31 = arith.mulf %30, %29 : vector<8x128xf32>
    %cst_18 = arith.constant dense<0.000000e+00> : vector<8x128xf32>
    %32 = tpu.matmul %10, %24, %cst_18 {dimension_numbers = #tpu.dot_dimension_numbers<[1], [0], [0], [1], [0, 0, 1, 1], [], []>} : vector<8x128xbf16>, vector<128x128xbf16>, vector<8x128xf32> -> vector<8x128xf32>
    %33 = arith.addf %31, %32 : vector<8x128xf32>
    %c0_19 = arith.constant 0 : index
    %c0_20 = arith.constant 0 : index
    %34 = vector.load %arg10[%c0_19, %c0_20] : memref<8x256xf32, #tpu.memory_space<vmem>>, vector<8x128xf32>
    tpu.vector_store %arg10[%c0_19, %c0_20], %33 {strides = array<i32>} : memref<8x256xf32, #tpu.memory_space<vmem>>, vector<8x128xf32>,
    %c0_21 = arith.constant 0 : index
    %c0_22 = arith.constant 0 : index
    %35 = vector.load %arg11[%c0_21, %c0_22] : memref<1x256xf32, #tpu.memory_space<vmem>>, vector<1x128xf32>
    tpu.vector_store %arg11[%c0_21, %c0_22], %16 {strides = array<i32>} : memref<1x256xf32, #tpu.memory_space<vmem>>, vector<1x128xf32>,
    %c0_23 = arith.constant 0 : index
    %c128 = arith.constant 128 : index
    %36 = vector.load %arg9[%c0_23, %c128] : memref<8x256xf32, #tpu.memory_space<vmem>>, vector<8x128xf32>
    %cst_24 = arith.constant dense<0.000000e+00> : vector<128x128xf32>
    %37 = tpu.matmul %9, %36, %cst_24 {dimension_numbers = #tpu.dot_dimension_numbers<[0], [0], [1], [1], [0, 1, 1, 1], [], []>} : vector<8x128xf32>, vector<8x128xf32>, vector<128x128xf32> -> vector<128x128xf32>
    %c0_25 = arith.constant 0 : index
    %c128_26 = arith.constant 128 : index
    %38 = vector.load %arg11[%c0_25, %c128_26] : memref<1x256xf32, #tpu.memory_space<vmem>>, vector<1x128xf32>
    %cst_27 = arith.constant dense<0xFF800000> : vector<128xf32>
    %39 = vector.multi_reduction <maximumf>, %37, %cst_27 [0] : vector<128x128xf32> to vector<128xf32>
    %40 = vector.shape_cast %39 : vector<128xf32> to vector<1x128xf32>
    %41 = arith.maximumf %38, %40 : vector<1x128xf32>
    %42 = arith.subf %38, %41 : vector<1x128xf32>
    %43 = math.exp %42 : vector<1x128xf32>
    %44 = vector.broadcast %41 : vector<1x128xf32> to vector<128x128xf32>
    %45 = arith.subf %37, %44 : vector<128x128xf32>
    %46 = math.exp %45 : vector<128x128xf32>
    %cst_28 = arith.constant dense<0.000000e+00> : vector<128xf32>
    %47 = vector.multi_reduction <add>, %46, %cst_28 [0] : vector<128x128xf32> to vector<128xf32>
    %48 = vector.shape_cast %47 : vector<128xf32> to vector<1x128xf32>
    %49 = arith.truncf %46 : vector<128x128xf32> to vector<128x128xbf16>
    %c0_29 = arith.constant 0 : index
    %c128_30 = arith.constant 128 : index
    %50 = vector.load %arg12[%c0_29, %c128_30] : memref<1x256xf32, #tpu.memory_space<vmem>>, vector<1x128xf32>
    %51 = arith.mulf %43, %50 : vector<1x128xf32>
    %52 = arith.addf %51, %48 : vector<1x128xf32>
    %c0_31 = arith.constant 0 : index
    %c128_32 = arith.constant 128 : index
    %53 = vector.load %arg12[%c0_31, %c128_32] : memref<1x256xf32, #tpu.memory_space<vmem>>, vector<1x128xf32>
    tpu.vector_store %arg12[%c0_31, %c128_32], %52 {strides = array<i32>} : memref<1x256xf32, #tpu.memory_space<vmem>>, vector<1x128xf32>,
    %c0_33 = arith.constant 0 : index
    %c128_34 = arith.constant 128 : index
    %54 = vector.load %arg10[%c0_33, %c128_34] : memref<8x256xf32, #tpu.memory_space<vmem>>, vector<8x128xf32>
    %55 = vector.broadcast %43 : vector<1x128xf32> to vector<8x128xf32>
    %56 = arith.mulf %55, %54 : vector<8x128xf32>
    %cst_35 = arith.constant dense<0.000000e+00> : vector<8x128xf32>
    %57 = tpu.matmul %10, %49, %cst_35 {dimension_numbers = #tpu.dot_dimension_numbers<[1], [0], [0], [1], [0, 0, 1, 1], [], []>} : vector<8x128xbf16>, vector<128x128xbf16>, vector<8x128xf32> -> vector<8x128xf32>
    %58 = arith.addf %56, %57 : vector<8x128xf32>
    %c0_36 = arith.constant 0 : index
    %c128_37 = arith.constant 128 : index
    %59 = vector.load %arg10[%c0_36, %c128_37] : memref<8x256xf32, #tpu.memory_space<vmem>>, vector<8x128xf32>
    tpu.vector_store %arg10[%c0_36, %c128_37], %58 {strides = array<i32>} : memref<8x256xf32, #tpu.memory_space<vmem>>, vector<8x128xf32>,
    %c0_38 = arith.constant 0 : index
    %c128_39 = arith.constant 128 : index
    %60 = vector.load %arg11[%c0_38, %c128_39] : memref<1x256xf32, #tpu.memory_space<vmem>>, vector<1x128xf32>
    tpu.vector_store %arg11[%c0_38, %c128_39], %41 {strides = array<i32>} : memref<1x256xf32, #tpu.memory_space<vmem>>, vector<1x128xf32>,
    %61 = vector.extract_strided_slice %7 {offsets = [0, 128], sizes = [8, 128], strides = [1, 1]} : vector<8x256xf32> to vector<8x128xf32>
    %62 = vector.extract_strided_slice %8 {offsets = [0, 128], sizes = [8, 128], strides = [1, 1]} : vector<8x256xbf16> to vector<8x128xbf16>
    %c0_40 = arith.constant 0 : index
    %c0_41 = arith.constant 0 : index
    %63 = vector.load %arg9[%c0_40, %c0_41] : memref<8x256xf32, #tpu.memory_space<vmem>>, vector<8x128xf32>
    %cst_42 = arith.constant dense<0.000000e+00> : vector<128x128xf32>
    %64 = tpu.matmul %61, %63, %cst_42 {dimension_numbers = #tpu.dot_dimension_numbers<[0], [0], [1], [1], [0, 1, 1, 1], [], []>} : vector<8x128xf32>, vector<8x128xf32>, vector<128x128xf32> -> vector<128x128xf32>
    %c0_43 = arith.constant 0 : index
    %c0_44 = arith.constant 0 : index
    %65 = vector.load %arg11[%c0_43, %c0_44] : memref<1x256xf32, #tpu.memory_space<vmem>>, vector<1x128xf32>
    %cst_45 = arith.constant dense<0xFF800000> : vector<128xf32>
    %66 = vector.multi_reduction <maximumf>, %64, %cst_45 [0] : vector<128x128xf32> to vector<128xf32>
    %67 = vector.shape_cast %66 : vector<128xf32> to vector<1x128xf32>
    %68 = arith.maximumf %65, %67 : vector<1x128xf32>
    %69 = arith.subf %65, %68 : vector<1x128xf32>
    %70 = math.exp %69 : vector<1x128xf32>
    %71 = vector.broadcast %68 : vector<1x128xf32> to vector<128x128xf32>
    %72 = arith.subf %64, %71 : vector<128x128xf32>
    %73 = math.exp %72 : vector<128x128xf32>
    %cst_46 = arith.constant dense<0.000000e+00> : vector<128xf32>
    %74 = vector.multi_reduction <add>, %73, %cst_46 [0] : vector<128x128xf32> to vector<128xf32>
    %75 = vector.shape_cast %74 : vector<128xf32> to vector<1x128xf32>
    %76 = arith.truncf %73 : vector<128x128xf32> to vector<128x128xbf16>
    %c0_47 = arith.constant 0 : index
    %c0_48 = arith.constant 0 : index
    %77 = vector.load %arg12[%c0_47, %c0_48] : memref<1x256xf32, #tpu.memory_space<vmem>>, vector<1x128xf32>
    %78 = arith.mulf %70, %77 : vector<1x128xf32>
    %79 = arith.addf %78, %75 : vector<1x128xf32>
    %c0_49 = arith.constant 0 : index
    %c0_50 = arith.constant 0 : index
    %80 = vector.load %arg12[%c0_49, %c0_50] : memref<1x256xf32, #tpu.memory_space<vmem>>, vector<1x128xf32>
    tpu.vector_store %arg12[%c0_49, %c0_50], %79 {strides = array<i32>} : memref<1x256xf32, #tpu.memory_space<vmem>>, vector<1x128xf32>,
    %c0_51 = arith.constant 0 : index
    %c0_52 = arith.constant 0 : index
    %81 = vector.load %arg10[%c0_51, %c0_52] : memref<8x256xf32, #tpu.memory_space<vmem>>, vector<8x128xf32>
    %82 = vector.broadcast %70 : vector<1x128xf32> to vector<8x128xf32>
    %83 = arith.mulf %82, %81 : vector<8x128xf32>
    %cst_53 = arith.constant dense<0.000000e+00> : vector<8x128xf32>
    %84 = tpu.matmul %62, %76, %cst_53 {dimension_numbers = #tpu.dot_dimension_numbers<[1], [0], [0], [1], [0, 0, 1, 1], [], []>} : vector<8x128xbf16>, vector<128x128xbf16>, vector<8x128xf32> -> vector<8x128xf32>
    %85 = arith.addf %83, %84 : vector<8x128xf32>
    %c0_54 = arith.constant 0 : index
    %c0_55 = arith.constant 0 : index
    %86 = vector.load %arg10[%c0_54, %c0_55] : memref<8x256xf32, #tpu.memory_space<vmem>>, vector<8x128xf32>
    tpu.vector_store %arg10[%c0_54, %c0_55], %85 {strides = array<i32>} : memref<8x256xf32, #tpu.memory_space<vmem>>, vector<8x128xf32>,
    %c0_56 = arith.constant 0 : index
    %c0_57 = arith.constant 0 : index
    %87 = vector.load %arg11[%c0_56, %c0_57] : memref<1x256xf32, #tpu.memory_space<vmem>>, vector<1x128xf32>
    tpu.vector_store %arg11[%c0_56, %c0_57], %68 {strides = array<i32>} : memref<1x256xf32, #tpu.memory_space<vmem>>, vector<1x128xf32>,
    %c0_58 = arith.constant 0 : index
    %c128_59 = arith.constant 128 : index
    %88 = vector.load %arg9[%c0_58, %c128_59] : memref<8x256xf32, #tpu.memory_space<vmem>>, vector<8x128xf32>
    %cst_60 = arith.constant dense<0.000000e+00> : vector<128x128xf32>
    %89 = tpu.matmul %61, %88, %cst_60 {dimension_numbers = #tpu.dot_dimension_numbers<[0], [0], [1], [1], [0, 1, 1, 1], [], []>} : vector<8x128xf32>, vector<8x128xf32>, vector<128x128xf32> -> vector<128x128xf32>
    %c0_61 = arith.constant 0 : index
    %c128_62 = arith.constant 128 : index
    %90 = vector.load %arg11[%c0_61, %c128_62] : memref<1x256xf32, #tpu.memory_space<vmem>>, vector<1x128xf32>
    %cst_63 = arith.constant dense<0xFF800000> : vector<128xf32>
    %91 = vector.multi_reduction <maximumf>, %89, %cst_63 [0] : vector<128x128xf32> to vector<128xf32>
    %92 = vector.shape_cast %91 : vector<128xf32> to vector<1x128xf32>
    %93 = arith.maximumf %90, %92 : vector<1x128xf32>
    %94 = arith.subf %90, %93 : vector<1x128xf32>
    %95 = math.exp %94 : vector<1x128xf32>
    %96 = vector.broadcast %93 : vector<1x128xf32> to vector<128x128xf32>
    %97 = arith.subf %89, %96 : vector<128x128xf32>
    %98 = math.exp %97 : vector<128x128xf32>
    %cst_64 = arith.constant dense<0.000000e+00> : vector<128xf32>
    %99 = vector.multi_reduction <add>, %98, %cst_64 [0] : vector<128x128xf32> to vector<128xf32>
    %100 = vector.shape_cast %99 : vector<128xf32> to vector<1x128xf32>
    %101 = arith.truncf %98 : vector<128x128xf32> to vector<128x128xbf16>
    %c0_65 = arith.constant 0 : index
    %c128_66 = arith.constant 128 : index
    %102 = vector.load %arg12[%c0_65, %c128_66] : memref<1x256xf32, #tpu.memory_space<vmem>>, vector<1x128xf32>
    %103 = arith.mulf %95, %102 : vector<1x128xf32>
    %104 = arith.addf %103, %100 : vector<1x128xf32>
    %c0_67 = arith.constant 0 : index
    %c128_68 = arith.constant 128 : index
    %105 = vector.load %arg12[%c0_67, %c128_68] : memref<1x256xf32, #tpu.memory_space<vmem>>, vector<1x128xf32>
    tpu.vector_store %arg12[%c0_67, %c128_68], %104 {strides = array<i32>} : memref<1x256xf32, #tpu.memory_space<vmem>>, vector<1x128xf32>,
    %c0_69 = arith.constant 0 : index
    %c128_70 = arith.constant 128 : index
    %106 = vector.load %arg10[%c0_69, %c128_70] : memref<8x256xf32, #tpu.memory_space<vmem>>, vector<8x128xf32>
    %107 = vector.broadcast %95 : vector<1x128xf32> to vector<8x128xf32>
    %108 = arith.mulf %107, %106 : vector<8x128xf32>
    %cst_71 = arith.constant dense<0.000000e+00> : vector<8x128xf32>
    %109 = tpu.matmul %62, %101, %cst_71 {dimension_numbers = #tpu.dot_dimension_numbers<[1], [0], [0], [1], [0, 0, 1, 1], [], []>} : vector<8x128xbf16>, vector<128x128xbf16>, vector<8x128xf32> -> vector<8x128xf32>
    %110 = arith.addf %108, %109 : vector<8x128xf32>
    %c0_72 = arith.constant 0 : index
    %c128_73 = arith.constant 128 : index
    %111 = vector.load %arg10[%c0_72, %c128_73] : memref<8x256xf32, #tpu.memory_space<vmem>>, vector<8x128xf32>
    tpu.vector_store %arg10[%c0_72, %c128_73], %110 {strides = array<i32>} : memref<8x256xf32, #tpu.memory_space<vmem>>, vector<8x128xf32>,
    %c0_74 = arith.constant 0 : index
    %c128_75 = arith.constant 128 : index
    %112 = vector.load %arg11[%c0_74, %c128_75] : memref<1x256xf32, #tpu.memory_space<vmem>>, vector<1x128xf32>
    tpu.vector_store %arg11[%c0_74, %c128_75], %93 {strides = array<i32>} : memref<1x256xf32, #tpu.memory_space<vmem>>, vector<1x128xf32>,
    %c0_i32_76 = arith.constant 0 : i32
    %113 = arith.cmpi eq, %arg2, %c0_i32_76 : i32
    %114 = arith.extui %113 : i1 to i32
    %c0_i32_77 = arith.constant 0 : i32
    %115 = arith.cmpi ne, %114, %c0_i32_77 : i32
    scf.if %115 {
      %c0_78 = arith.constant 0 : index
      %c0_79 = arith.constant 0 : index
      %116 = vector.load %arg12[%c0_78, %c0_79] : memref<1x256xf32, #tpu.memory_space<vmem>>, vector<1x256xf32>
      %117 = tpu.reciprocal %116 : vector<1x256xf32> -> vector<1x256xf32>
      %c0_80 = arith.constant 0 : index
      %c0_81 = arith.constant 0 : index
      %118 = vector.load %arg10[%c0_80, %c0_81] : memref<8x256xf32, #tpu.memory_space<vmem>>, vector<8x256xf32>
      %119 = vector.broadcast %117 : vector<1x256xf32> to vector<8x256xf32>
      %120 = arith.mulf %118, %119 : vector<8x256xf32>
      %c0_82 = arith.constant 0 : index
      %c0_83 = arith.constant 0 : index
      %121 = vector.load %arg7[%c0_82, %c0_83] : memref<32x8xf32, #tpu.memory_space<vmem>>, vector<32x8xf32>
      %cst_84 = arith.constant dense<0.000000e+00> : vector<32x256xf32>
      %122 = tpu.matmul %121, %120, %cst_84 {dimension_numbers = #tpu.dot_dimension_numbers<[1], [0], [0], [1], [0, 0, 1, 1], [], []>} : vector<32x8xf32>, vector<8x256xf32>, vector<32x256xf32> -> vector<32x256xf32>
      %c0_85 = arith.constant 0 : index
      %c0_86 = arith.constant 0 : index
      %c0_87 = arith.constant 0 : index
      %123 = vector.load %arg3[%c0_85, %c0_86, %c0_87] : memref<1x32x256xf32, #tpu.memory_space<vmem>>, vector<1x32x256xf32>
      %124 = vector.shape_cast %123 : vector<1x32x256xf32> to vector<32x256xf32>
      %125 = arith.addf %122, %124 : vector<32x256xf32>
      %c0_88 = arith.constant 0 : index
      %c0_89 = arith.constant 0 : index
      %c0_90 = arith.constant 0 : index
      %126 = vector.load %arg8[%c0_88, %c0_89, %c0_90] : memref<1x32x256xf32, #tpu.memory_space<vmem>>, vector<1x32x256xf32>
      %127 = vector.shape_cast %126 : vector<1x32x256xf32> to vector<32x256xf32>
      %128 = vector.shape_cast %125 : vector<32x256xf32> to vector<1x32x256xf32>
      tpu.vector_store %arg8[%c0_88, %c0_89, %c0_90], %128 {strides = array<i32>} : memref<1x32x256xf32, #tpu.memory_space<vmem>>, vector<1x32x256xf32>,
    } else {
    }
    return
  }
  func.func @transform_0(%arg0: i32, %arg1: i32, %arg2: i32) -> (i32, i32, i32) {
    %c0_i32 = arith.constant 0 : i32
    %c0_i32_0 = arith.constant 0 : i32
    return %arg0, %c0_i32, %arg1 : i32, i32, i32
  }
  func.func @transform_1(%arg0: i32, %arg1: i32, %arg2: i32) -> (i32, i32, i32) {
    %c0_i32 = arith.constant 0 : i32
    %c0_i32_0 = arith.constant 0 : i32
    return %arg0, %c0_i32, %arg2 : i32, i32, i32
  }
  func.func @transform_2(%arg0: i32, %arg1: i32, %arg2: i32) -> (i32, i32) {
    %c0_i32 = arith.constant 0 : i32
    %c0_i32_0 = arith.constant 0 : i32
    %c0_i32_1 = arith.constant 0 : i32
    return %c0_i32, %c0_i32_0 : i32, i32
  }
  func.func @transform_3(%arg0: i32, %arg1: i32, %arg2: i32) -> (i32, i32) {
    %c0_i32 = arith.constant 0 : i32
    %c0_i32_0 = arith.constant 0 : i32
    %c0_i32_1 = arith.constant 0 : i32
    return %c0_i32, %c0_i32_0 : i32, i32
  }
  func.func @transform_4(%arg0: i32, %arg1: i32, %arg2: i32) -> (i32, i32) {
    %c0_i32 = arith.constant 0 : i32
    %c0_i32_0 = arith.constant 0 : i32
    %c0_i32_1 = arith.constant 0 : i32
    return %c0_i32, %c0_i32_0 : i32, i32
  }
  func.func @transform_5(%arg0: i32, %arg1: i32, %arg2: i32) -> (i32, i32, i32) {
    %c0_i32 = arith.constant 0 : i32
    %c0_i32_0 = arith.constant 0 : i32
    return %arg0, %c0_i32, %arg1 : i32, i32, i32
  }
}

</mosaic_0001>

<bundles_post_ra>
// kernel: tpu_custom_call.1
= control target key start
LH: loop header
LB: loop body
LE: loop exit
PB: predicated region body
PF: predicated region fallthrough
CT: control target
= control target key end

     0   :  { %s3877_s0 = inlined_call_operand.hbm [shape: f32[2,32,256], index: 0, kind: input, shape index: {}]   ;;  %s3878_s1 = inlined_call_operand.hbm [shape: bf16[2,32,256], index: 1, kind: input, shape index: {}]   ;;  %s3879_s2 = inlined_call_operand.vmem [shape: f32[8,32], index: 2, kind: input, shape index: {}]   ;;  %s3880_s3 = inlined_call_operand.vmem [shape: f32[8,32], index: 3, kind: input, shape index: {}]   ;;  %s3881_s4 = inlined_call_operand.vmem [shape: f32[32,8], index: 4, kind: input, shape index: {}]   ;;  %s3882_s5 = inlined_call_operand.hbm [shape: f32[2,32,256], index: 5, kind: output, shape index: {}]  }
   0x1   :  { %3884 = sst [smem:[#allocation17_spill]] %s3877_s0 }
   0x2   :  { %10 = vsyncpa [#allocation7], 0 }
   0x3   :  { %12 = vsyncpa [#allocation7 + $0x1], 0 }
   0x4   :  { %13 = vsyncpa [#allocation10], 0 }
   0x5   :  { %15 = vsyncpa [#allocation10 + $0x1], 0 }
   0x6   :  { %16 = vsyncpa [#allocation8], 0 }
   0x7   :  { %18 = vsyncpa [#allocation8 + $0x1], 0  ;;  %s2960_s18 = smov 0   ;;  %s2962_s19 = smov 0  }
   0x8   :  { %s2964_s20 = smov 0   ;;  %s2966_s21 = smov 0  }
   0x9   :  { %s2968_s22 = smov 0   ;;  %s2970_s23 = smov 0  }
   0xa LB: > { %s2182_s24 = sadd.s32 4294967295, %s2916_s23   ;;  %s2183_s25 = sadd.s32 4294967294, %s2916_s23   ;;  %s2916_s23 = sphi %s2970_s23, %s24_s23   ;;  %s2912_s22 = sphi %s2968_s22, %s3902_s22   ;;  %s2908_s21 = sphi %s2966_s21, %s3901_s21   ;;  %s2904_s20 = sphi %s2964_s20, %s3900_s20   ;;  %s2900_s19 = sphi %s2962_s19, %s3899_s19   ;;  %s2896_s18 = sphi %s2960_s18, %s3898_s18  }
   0xb   : > { %s43_s26 = sadd.s32 1, %s2912_s22  ;;  %s52_s27 = sadd.s32 1, %s2904_s20 }
   0xc   : > { %p45_p0 = scmp.ge.s32.totalorder %s43_s26, 2  ;;  %p59_p1 = scmp.ne.s32.totalorder %s2904_s20, %s2900_s19 }
   0xd   : > { %p60_p2 = scmp.eq.s32.totalorder %s2916_s23, 0  ;;  %p65_p3 = scmp.ne.s32.totalorder %s2900_s19, %s2896_s18 }
   0xe   : > { %s3904_s26 = smov (%p45_p0, %s43_s26), 0  ;;  %p66_p5 = scmp.eq.s32.totalorder %s2182_s24, 0 }
   0xf   : > { %3885 = sst [smem:[#allocation15_spill]] %s3904_s26  ;;  %p3001_p4 = por %p60_p2, %p59_p1 }
  0x10   : > { %s47_s29 = ssub.s32 %s2912_s22, %s3904_s26  ;;  %p182_p6 = scmp.eq.s32.totalorder %s2182_s24, 1 }
  0x11   : > { %p50_p7 = scmp.eq.s32.totalorder %s47_s29, 0  ;;  %p3007_p8 = por %p66_p5, %p65_p3 }
  0x12   : > { %p3011_p9 = por %p182_p6, %p59_p1  ;;  %p188_p10 = scmp.eq.s32.totalorder %s2183_s25, 1 }
  0x13   : > { %s3016_s7 = scalar_select %p50_p7, %s2904_s20, %s52_s27  }
  0x14   : > { %p3018_p11 = por %p188_p10, %p65_p3  ;;  %p2185_p12 = scmp.ge.s32.totalorder %s2916_s23, 2 }
  0x15   : > { %3889 = sst [smem:[#allocation16_spill]] %s3016_s7  ;;  %p2579_p13 = scmp.lt.s32.totalorder %s2916_s23, 2 }
  0x16   : > { %s3025_s9 = sand.u32 1, %s2904_s20   ;;  %s2271_s11 = sshll.u32 %s2912_s22, 10 }
  0x17   : > { %s2186_s10 = sshll.u32 %s3025_s9, 6  ;;  %s3891_s0 = sld [smem:[#allocation17_spill]] }
  0x18   : > { %s221_s15 = scalar_lea.vmem [#allocation6], %s2186_s10  ;;  %p3034_p0 = pnand %p2579_p13, %p3001_p4 }
  0x19   : > { %s230_s16 = sshll.u32 %s221_s15, 4  ;;  %p2192_p1 = scmp.ge.s32.totalorder %s2916_s23, 1  ;;  %s231_s16 = int_to_ptr.vmem [resolvable:$true] %s230_s16 }
  0x1a   : > { %s218_s24 = scalar_lea.sflag [#allocation7], %s3025_s9  ;;  %p2778_p2 = pneg %p3034_p0 }
  0x1b   : > { %s2789_s25 = scalar_lea.vmem %s231_s16, 1024  ;;  %s2918_s27 = smov [#allocation6]  }
  0x1c   : > { %p2790_p3 = scmp.ne.s32.totalorder %s231_s16, %s2789_s25  ;;  %s2794_s29 = sshll.u32 %s2918_s27, 4  ;;  %s2795_s29 = int_to_ptr.vmem [resolvable:$false] %s2794_s29 }
  0x1d   : > { %s229_s14 = scalar_lea.hbm %s3891_s0, %s2271_s11  ;;  %s2796_s28 = scalar_lea.vmem %s2795_s29, 2048 }
  0x1e   : > { %p2792_p5 = pnand %p2790_p3, %p2778_p2  ;;  %p2797_p4 = scmp.lt.s32.totalorder %s231_s16, %s2795_s29 }
  0x1f   : > { %p2798_p7 = scmp.lt.s32.totalorder %s2796_s28, %s2789_s25 }
  0x20   : > { %p2793_p6 = pneg %p2792_p5 }
  0x21   : > { %p2799_p10 = por %p2798_p7, %p2797_p4 }
  0x23   : > { %p2800_p13 = pnand %p2799_p10, %p2793_p6 }
  0x25   : > { %2803 = shalt.err (!%p2800_p13)
}
  0x26   : > { %s2919_s10 = smov 256   ;;  %s2920_s11 = smov 16  }
  0x27   : > { %2571 = dma.hbm_to_vmem [thread:$0]  (!%p3034_p0), %s229_s14, 1024, %s231_s16, %s218_s24, %s2919_s10, %s2919_s10, %s2920_s11  }
  0x28   : > { %p261_p3 = scmp.lt.s32.totalorder %s2916_s23, 3  ;;  %s2189_s12 = sshll.u32 %s3025_s9, 5 }
  0x29   : > { %s2272_s13 = sshll.u32 %s2912_s22, 9  ;;  %s244_s28 = scalar_lea.vmem [#allocation9], %s2189_s12 }
  0x2a   : > { %p3052_p5 = pnand %p2192_p1, %p261_p3  ;;  %s252_s29 = scalar_lea.hbm %s3878_s1, %s2272_s13 }
  0x2b   : > { %s253_s0 = sshll.u32 %s244_s28, 4  ;;  %s241_s26 = scalar_lea.sflag [#allocation10], %s3025_s9  ;;  %s254_s0 = int_to_ptr.vmem [resolvable:$true] %s253_s0 }
  0x2c   : > { %s2817_s7 = scalar_lea.vmem %s254_s0, 512  ;;  %s2921_s14 = smov [#allocation9]  }
  0x2d   : > { %p2818_p6 = scmp.ne.s32.totalorder %s254_s0, %s2817_s7  ;;  %s2822_s16 = sshll.u32 %s2921_s14, 4  ;;  %s2823_s16 = int_to_ptr.vmem [resolvable:$false] %s2822_s16 }
  0x2e   : > { %s2824_s24 = scalar_lea.vmem %s2823_s16, 1024  ;;  %p2825_p1 = scmp.lt.s32.totalorder %s254_s0, %s2823_s16 }
  0x2f   : > { %p2820_p4 = pnand %p2818_p6, %p2778_p2  ;;  %p2826_p10 = scmp.lt.s32.totalorder %s2824_s24, %s2817_s7 }
  0x31   : > { %p2821_p7 = pneg %p2820_p4  ;;  %p2827_p13 = por %p2826_p10, %p2825_p1 }
  0x33   : > { %p2828_p3 = pnand %p2827_p13, %p2821_p7 }
  0x35   : > { %2831 = shalt.err (!%p2828_p3)
}
  0x36   : > { %s2922_s10 = smov 128   ;;  %s2923_s11 = smov 8  }
  0x37   : > { %2574 = dma.hbm_to_vmem [thread:$0]  (!%p3034_p0), %s252_s29, 512, %s254_s0, %s241_s26, %s2922_s10, %s2922_s10, %s2923_s11  }
  0x38   : > { %265 = sbr.rel (%p3052_p5) target bundleno = 1533 (0x5fd), region = 40  ;;  %s3068_s9 = sand.u32 (!%p3052_p5), 1, %s2900_s19  }
  0x39   : > { %s2193_s12 = sshll.u32 (!%p3052_p5), %s3068_s9, 6  ;;  %s268_s7 = scalar_lea.sflag (!%p3052_p5), [#allocation7], %s3068_s9 }
  0x3a   : > { %s3074_s13 = scalar_lea.vmem (!%p3052_p5), [#allocation6], %s2193_s12 }
  0x3d   : > { %2883 = dma.done.wait (%p3007_p8), %s268_s7, 1024  }
  0x3e   : > { %2885 = vsyncadd (%p3007_p8), %s268_s7, 4294966272  ;;  %s2194_s0 = sshll.u32 %s3068_s9, 5  ;;  %s277_s26 = scalar_lea.sflag [#allocation10], %s3068_s9 }
  0x3f   : > { %s280_s17 = scalar_lea.vmem [#allocation9], %s2194_s0 }
  0x40   : > { %2887 = dma.done.wait (%p3007_p8), %s277_s26, 512  }
  0x41   : > { %2889 = vsyncadd (%p3007_p8), %s277_s26, 4294966784  ;;  %v2924_v0 = vmov 0.0   ;;  %v328_v1 = vld [vmem:[%s3074_s13 + $0x38] sm:$0xff]  ;;  %v327_v2 = vld [vmem:[%s3074_s13 + $0x30] sm:$0xff]  ;;  %vm329_vm0 = vcmask 261120   ;;  %vm537_vm1 = vcmask 64512   ;;  %v406_v43 = vlaneseq }
  0x42   : > { %397 = vmatprep.mubr.f32.mxu1 %v2924_v0  ;;  %v326_v3 = vld [vmem:[%s3074_s13 + $0x28] sm:$0xff]  ;;  %357 = vmatprep.subr.mxu1 %v328_v1  ;;  %v325_v4 = vld [vmem:[%s3074_s13 + $0x20] sm:$0xff]  ;;  %v324_v5 = vld [vmem:[%s3074_s13 + $0x18] sm:$0xff]  ;;  %v2925_v44 = vmov -inf   ;;  %vm2926_vm3 = vmmov 0   ;;  %s311_s0 = scalar_lea.vmem [#allocation11], %s2193_s12 }
  0x43   : > { %358 = vmatpush1.msra.mxu1 %v327_v2  ;;  %v323_v6 = vld [vmem:[%s3074_s13 + $0x10] sm:$0xff]  ;;  %v418_v7 = vld [vmem:[%s280_s17 + $0x18] sm:$0xff]  ;;  %v322_v8 = vld [vmem:[%s3074_s13 + $0x8] sm:$0xff]  ;;  %vm408_vm2 = vcmp.lt.s32.totalorder %v406_v43, 256  ;;  %vm3265_vm4 = vcmp.lt.s32.totalorder %v406_v43, 128  ;;  %s2066_s26 = sshll.u32 %s311_s0, 4  ;;  %s3824_s26 = int_to_ptr.vmem [resolvable:$true] %s2066_s26 }
  0x44   : > { %359 = vmatprep.subr.mxu1 %v326_v3  ;;  %v417_v9 = vld [vmem:[%s280_s17 + $0x10] sm:$0xff]  ;;  %v321_v10 = vld [vmem:[%s3074_s13] sm:$0xff]  ;;  %v426_v11 = vunpack.c.h.bf16 %v418_v7  ;;  %v425_v13 = vunpack.c.l.bf16 %v418_v7  ;;  %v416_v14 = vld [vmem:[%s280_s17 + $0x8] sm:$0xff]  ;;  %410 = vst.msk [vmem:[#allocation4] sm:$0x3] %vm408_vm2, %v2925_v44  ;;  %s2273_s12 = sshll.u32 %s2908_s21, 10 }
  0x45   : > { %360 = vmatpush1.msra.mxu1 %v325_v4  ;;  %v320_v12 = vld [vmem:[%s3879_s2] sm:$0xff]  ;;  %v424_v15 = vunpack.c.h.bf16 %v417_v9  ;;  %v423_v16 = vunpack.c.l.bf16 %v417_v9  ;;  %v422_v18 = vunpack.c.h.bf16 %v416_v14  ;;  %v421_v19 = vunpack.c.l.bf16 %v416_v14  ;;  %411 = vst.msk [vmem:[#allocation5] sm:$0x3] %vm408_vm2, %v2924_v0  ;;  %s3829_s15 = scalar_lea.hbm %s3882_s5, %s2273_s12  ;;  %s2051_s25 = scalar_lea.sflag [#allocation8], %s3068_s9 }
  0x46   : > { %361 = vmatprep.subr.mxu1 %v324_v5  ;;  %v415_v17 = vld [vmem:[%s280_s17] sm:$0xff]  ;;  %s2832_s21 = scalar_lea.vmem %s3824_s26, 1024 }
  0x47   : > { %362 = vmatpush1.msra.mxu1 %v323_v6  ;;  %v420_v20 = vunpack.c.h.bf16 %v415_v17  ;;  %v419_v21 = vunpack.c.l.bf16 %v415_v17  ;;  %v414_v22 = vld [vmem:[%s3880_s3] sm:$0xff]  ;;  %p2833_p8 = scmp.ne.s32.totalorder %s3824_s26, %s2832_s21 }
  0x48   : > { %363 = vmatprep.subr.mxu1 %v322_v8 }
  0x49   : > { %364 = vmatpush1.msra.mxu1 %v321_v10  ;;  %p2834_p0 = pnand %p2833_p8, %p3011_p9 }
  0x4a   : > { %2196 = vmatmul.mubr.msk.f32.vlgmr.msra.gmra.mxu1 %vm329_vm0, %v320_v12  ;;  %455 = vmatprep.subr.mxu1 %v426_v11 }
  0x4b   : > { %456 = vmatpush1.msra.mxu1 %v425_v13  ;;  %495 = vmatprep.mubr.f32.mxu1 %v2924_v0  ;;  %p2835_p2 = pneg %p2834_p0 }
  0x4c   : > { %457 = vmatprep.subr.mxu1 %v424_v15 }
  0x4d   : > { %458 = vmatpush1.msra.mxu1 %v423_v16 }
  0x4e   : > { %459 = vmatprep.subr.mxu1 %v422_v18 }
  0x4f   : > { %460 = vmatpush1.msra.mxu1 %v421_v19 }
  0x50   : > { %461 = vmatprep.subr.mxu1 %v420_v20 }
  0x51   : > { %462 = vmatpush1.msra.mxu1 %v419_v21 }
  0x52   : > { %2197 = vmatmul.mubr.msk.f32.vlgmr.msra.gmra.mxu1 %vm329_vm0, %v414_v22 }
 0x10a   : > { %v3104_v23 = vpop.f32.mrf.mxu1 }
 0x10b   : > { %2378 = vmatprep.subr.mxu1 %v3104_v23 }
 0x10c   : > { %v3107_v24 = vpop.f32.mrf.mxu1  ;;  %2379 = vmatpush3.msra.mxu1 %v3104_v23 }
 0x10d   : > { %2424 = vmatprep.subr.mxu0 %v3107_v24  ;;  %2404 = vmatprep.subr.bf16.mxu1 %v2924_v0 }
 0x10e   : > { %2425 = vmatpush3.msra.mxu0 %v3107_v24 }
 0x10f   : > { %2450 = vmatprep.subr.bf16.mxu0 %v2924_v0 }
 0x112   : > { %v3114_v25 = vpop.f32.mrf.mxu1 }
 0x113   : > { %505 = vxpose.xlu0.b32.start.end [1/1] (short) %v3114_v25, 128 }
 0x114   : > { %v3117_v26 = vpop.f32.mrf.mxu1 }
 0x150   : > { %1210 = vxpose.xlu0.b32.start.end [1/1] (short) %v3117_v26, 128 }
 0x18f   : > { %v521_v27 = vpop.trf.xlu0 }
 0x190   : > { %2380 = vmatprep.mubr.msk.f32.mxu1 %vm537_vm1, %v521_v27  ;;  %2426 = vmatprep.mubr.msk.f32.mxu0 %vm537_vm1, %v521_v27 }
 0x193   : > { %v522_v28 = vpop.trf.xlu0 }
 0x194   : > { %2381 = vmatmul.mubr.msk.f32.vlgmr.msra.gmra.mxu1 %vm537_vm1, %v522_v28  ;;  %2427 = vmatmul.mubr.msk.f32.vlgmr.msra.gmra.mxu0 %vm537_vm1, %v522_v28 }
 0x197   : > { %v523_v29 = vpop.trf.xlu0 }
 0x198   : > { %2383 = vmatprep.mubr.msk.f32.mxu1 %vm537_vm1, %v523_v29  ;;  %2429 = vmatprep.mubr.msk.f32.mxu0 %vm537_vm1, %v523_v29 }
 0x19b   : > { %v524_v30 = vpop.trf.xlu0 }
 0x19c   : > { %2384 = vmatmul.mubr.msk.f32.gmra.mxu1 %vm537_vm1, %v524_v30  ;;  %2430 = vmatmul.mubr.msk.f32.gmra.mxu0 %vm537_vm1, %v524_v30 }
 0x19f   : > { %v525_v31 = vpop.trf.xlu0 }
 0x1a0   : > { %2386 = vmatprep.mubr.msk.f32.mxu1 %vm537_vm1, %v525_v31  ;;  %2432 = vmatprep.mubr.msk.f32.mxu0 %vm537_vm1, %v525_v31 }
 0x1a3   : > { %v526_v32 = vpop.trf.xlu0 }
 0x1a4   : > { %2387 = vmatmul.mubr.msk.f32.gmra.mxu1 %vm537_vm1, %v526_v32  ;;  %2433 = vmatmul.mubr.msk.f32.gmra.mxu0 %vm537_vm1, %v526_v32 }
 0x1a7   : > { %v527_v33 = vpop.trf.xlu0 }
 0x1a8   : > { %2389 = vmatprep.mubr.msk.f32.mxu1 %vm537_vm1, %v527_v33  ;;  %2435 = vmatprep.mubr.msk.f32.mxu0 %vm537_vm1, %v527_v33 }
 0x1ab   : > { %v528_v34 = vpop.trf.xlu0 }
 0x1ac   : > { %2390 = vmatmul.mubr.msk.f32.gmra.mxu1 %vm537_vm1, %v528_v34  ;;  %2436 = vmatmul.mubr.msk.f32.gmra.mxu0 %vm537_vm1, %v528_v34 }
 0x1af   : > { %v529_v35 = vpop.trf.xlu0 }
 0x1b0   : > { %2392 = vmatprep.mubr.msk.f32.mxu1 %vm537_vm1, %v529_v35  ;;  %2438 = vmatprep.mubr.msk.f32.mxu0 %vm537_vm1, %v529_v35 }
 0x1b3   : > { %v530_v36 = vpop.trf.xlu0 }
 0x1b4   : > { %2393 = vmatmul.mubr.msk.f32.gmra.mxu1 %vm537_vm1, %v530_v36  ;;  %2439 = vmatmul.mubr.msk.f32.gmra.mxu0 %vm537_vm1, %v530_v36 }
 0x1b7   : > { %v531_v37 = vpop.trf.xlu0 }
 0x1b8   : > { %2395 = vmatprep.mubr.msk.f32.mxu1 %vm537_vm1, %v531_v37  ;;  %2441 = vmatprep.mubr.msk.f32.mxu0 %vm537_vm1, %v531_v37 }
 0x1bb   : > { %v532_v38 = vpop.trf.xlu0 }
 0x1bc   : > { %2396 = vmatmul.mubr.msk.f32.gmra.mxu1 %vm537_vm1, %v532_v38  ;;  %2442 = vmatmul.mubr.msk.f32.gmra.mxu0 %vm537_vm1, %v532_v38 }
 0x1bf   : > { %v533_v39 = vpop.trf.xlu0 }
 0x1c0   : > { %2398 = vmatprep.mubr.msk.f32.mxu1 %vm537_vm1, %v533_v39  ;;  %2444 = vmatprep.mubr.msk.f32.mxu0 %vm537_vm1, %v533_v39 }
 0x1c3   : > { %v534_v40 = vpop.trf.xlu0 }
 0x1c4   : > { %2399 = vmatmul.mubr.msk.f32.gmra.mxu1 %vm537_vm1, %v534_v40  ;;  %2445 = vmatmul.mubr.msk.f32.gmra.mxu0 %vm537_vm1, %v534_v40 }
 0x1c7   : > { %v535_v41 = vpop.trf.xlu0 }
 0x1c8   : > { %2401 = vmatprep.mubr.msk.f32.mxu1 %vm537_vm1, %v535_v41  ;;  %2447 = vmatprep.mubr.msk.f32.mxu0 %vm537_vm1, %v535_v41 }
 0x1cb   : > { %v536_v42 = vpop.trf.xlu0 }
 0x1cc   : > { %2402 = vmatmul.mubr.msk.f32.gmra.mxu1 %vm537_vm1, %v536_v42  ;;  %2448 = vmatmul.mubr.msk.f32.gmra.mxu0 %vm537_vm1, %v536_v42 }
 0x1cd   : > { %2420 = vmatprep.mubr.msk.bf16.mxu1 %vm2926_vm3, %v2924_v0  ;;  %2466 = vmatprep.mubr.msk.bf16.mxu0 %vm2926_vm3, %v2924_v0 }
 0x254   : > { %v3154_v45 = vpop.f32.mrf.mxu1  ;;  %v3156_v46 = vpop.f32.mrf.mxu0 }
 0x256   : > { %v3158_v47 = vpop.f32.mrf.mxu1  ;;  %v3160_v48 = vpop.f32.mrf.mxu0 }
 0x25c   : > { %v3162_v49 = vpop.f32.mrf.mxu1  ;;  %v3164_v50 = vpop.f32.mrf.mxu0 }
 0x25e   : > { %v3166_v51 = vpop.f32.mrf.mxu1  ;;  %v3168_v52 = vpop.f32.mrf.mxu0 }
 0x264   : > { %v3170_v53 = vpop.f32.mrf.mxu1  ;;  %v3172_v54 = vpop.f32.mrf.mxu0 }
 0x265   : > { %v733_v10 = vmax.f32 %v3154_v45, %v3170_v53  ;;  %v1047_v11 = vmax.f32 %v3156_v46, %v3172_v54 }
 0x266   : > { %v3174_v55 = vpop.f32.mrf.mxu1  ;;  %v3176_v56 = vpop.f32.mrf.mxu0 }
 0x267   : > { %v732_v8 = vmax.f32 %v3158_v47, %v3174_v55  ;;  %v1046_v9 = vmax.f32 %v3160_v48, %v3176_v56 }
 0x26c   : > { %v3178_v57 = vpop.f32.mrf.mxu1  ;;  %v3180_v58 = vpop.f32.mrf.mxu0 }
 0x26d   : > { %v735_v12 = vmax.f32 %v3162_v49, %v3178_v57  ;;  %v1049_v13 = vmax.f32 %v3164_v50, %v3180_v58 }
 0x26e   : > { %v3182_v59 = vpop.f32.mrf.mxu1  ;;  %v3184_v60 = vpop.f32.mrf.mxu0 }
 0x26f   : > { %v734_v16 = vmax.f32 %v3166_v51, %v3182_v59  ;;  %v1048_v17 = vmax.f32 %v3168_v52, %v3184_v60 }
 0x274   : > { %v3190_v61 = vpop.f32.mrf.mxu1  ;;  %v3192_v62 = vpop.f32.mrf.mxu0 }
 0x275   : > { %v737_v20 = vmax.f32 %v733_v10, %v3190_v61  ;;  %v1051_v21 = vmax.f32 %v1047_v11, %v3192_v62 }
 0x276   : > { %v3194_v63 = vpop.f32.mrf.mxu1  ;;  %v3196_v1 = vpop.f32.mrf.mxu0 }
 0x277   : > { %v736_v18 = vmax.f32 %v732_v8, %v3194_v63  ;;  %v1050_v19 = vmax.f32 %v1046_v9, %v3196_v1 }
 0x27c   : > { %v3198_v2 = vpop.f32.mrf.mxu1  ;;  %v3200_v3 = vpop.f32.mrf.mxu0 }
 0x27d   : > { %v739_v22 = vmax.f32 %v735_v12, %v3198_v2  ;;  %v1053_v27 = vmax.f32 %v1049_v13, %v3200_v3 }
 0x27e   : > { %v3202_v4 = vpop.f32.mrf.mxu1  ;;  %v3204_v5 = vpop.f32.mrf.mxu0 }
 0x27f   : > { %v738_v30 = vmax.f32 %v734_v16, %v3202_v4  ;;  %v1052_v31 = vmax.f32 %v1048_v17, %v3204_v5 }
 0x284   : > { %v3206_v6 = vpop.f32.mrf.mxu1  ;;  %v3208_v7 = vpop.f32.mrf.mxu0 }
 0x285   : > { %v741_v34 = vmax.f32 %v737_v20, %v3206_v6  ;;  %v1055_v35 = vmax.f32 %v1051_v21, %v3208_v7  ;;  %v3255_v21 = vshrl.u32 %v406_v43, 7 }
 0x286   : > { %v3222_v14 = vpop.f32.mrf.mxu1  ;;  %v3224_v15 = vpop.f32.mrf.mxu0 }
 0x287   : > { %v740_v32 = vmax.f32 %v736_v18, %v3222_v14  ;;  %v1054_v33 = vmax.f32 %v1050_v19, %v3224_v15 }
 0x289   : > { %v744_v42 = vmax.f32 %v740_v32, %v741_v34  ;;  %v1058_v44 = vmax.f32 %v1054_v33, %v1055_v35  ;;  %v3259_v32 = vld [vmem:[#allocation4 + $0x1] sm:$0x1]  ;;  %v3262_v34 = vsub.s32 0, %v3255_v21 }
 0x28c   : > { %v3236_v28 = vpop.f32.mrf.mxu1  ;;  %v3238_v29 = vpop.f32.mrf.mxu0 }
 0x28d   : > { %v743_v38 = vmax.f32 %v739_v22, %v3236_v28  ;;  %v1057_v39 = vmax.f32 %v1053_v27, %v3238_v29 }
 0x28e   : > { %v3246_v36 = vpop.f32.mrf.mxu1  ;;  %v3248_v37 = vpop.f32.mrf.mxu0 }
 0x28f   : > { %v742_v40 = vmax.f32 %v738_v30, %v3246_v36  ;;  %v1056_v41 = vmax.f32 %v1052_v31, %v3248_v37  ;;  %v3257_v31 = vld [vmem:[#allocation4] sm:$0x1] }
 0x291   : > { %v745_v8 = vmax.f32 %v742_v40, %v743_v38  ;;  %v1059_v9 = vmax.f32 %v1056_v41, %v1057_v39  ;;  %v1923_v38 = vsub.s32 1, %v3255_v21 }
 0x293   : > { %v746_v10 = vmax.f32 %v744_v42, %v745_v8  ;;  %v1060_v11 = vmax.f32 %v1058_v44, %v1059_v9 }
 0x295   : > { %v747_v12 = vrot.slane %v746_v10, 4  ;;  %v1061_v13 = vrot.slane %v1060_v11, 4 }
 0x297   : > { %v748_v16 = vmax.f32 %v746_v10, %v747_v12  ;;  %v1062_v17 = vmax.f32 %v1060_v11, %v1061_v13 }
 0x299   : > { %v749_v18 = vrot.slane %v748_v16, 2  ;;  %v1063_v19 = vrot.slane %v1062_v17, 2 }
 0x29b   : > { %v750_v20 = vmax.f32 %v748_v16, %v749_v18  ;;  %v1064_v22 = vmax.f32 %v1062_v17, %v1063_v19 }
 0x29d   : > { %v751_v27 = vrot.slane %v750_v20, 1  ;;  %v1065_v30 = vrot.slane %v1064_v22, 1 }
 0x29f   : > { %v752_v33 = vmax.f32 %v750_v20, %v751_v27  ;;  %v1066_v35 = vmax.f32 %v1064_v22, %v1065_v30 }
 0x2a1   : > { %v3270_v39 = vmax.f32 %v3257_v31, %v752_v33  ;;  %v3273_v40 = vmax.f32 %v3259_v32, %v1066_v35 }
 0x2a3   : > { %v761_v41 = vrot.slane %v3270_v39, %v3262_v34  ;;  %898 = vst.msk [vmem:[#allocation4] sm:$0x1] %vm3265_vm4, %v3270_v39  ;;  %1208 = vst.msk [vmem:[#allocation4 + $0x1] sm:$0x1] %vm3265_vm4, %v3273_v40 }
 0x2a5   : > { %v763_v43 = vsub.f32 %v3158_v47, %v761_v41  ;;  %v764_v42 = vsub.f32 %v3154_v45, %v761_v41  ;;  %v765_v44 = vsub.f32 %v3166_v51, %v761_v41  ;;  %v766_v8 = vsub.f32 %v3162_v49, %v761_v41 }
 0x2a6   : > { %v767_v9 = vsub.f32 %v3174_v55, %v761_v41  ;;  %v768_v10 = vsub.f32 %v3170_v53, %v761_v41  ;;  %v769_v13 = vsub.f32 %v3182_v59, %v761_v41  ;;  %v770_v17 = vsub.f32 %v3178_v57, %v761_v41 }
 0x2a7   : > { %v779_v11 = vmul.f32 1.442695, %v763_v43  ;;  %v781_v12 = vmul.f32 1.442695, %v764_v42  ;;  %v783_v16 = vmul.f32 1.442695, %v765_v44  ;;  %v771_v47 = vsub.f32 %v3194_v63, %v761_v41 }
 0x2a8   : > { %v785_v18 = vmul.f32 1.442695, %v766_v8  ;;  %v787_v45 = vmul.f32 1.442695, %v767_v9  ;;  %v772_v51 = vsub.f32 %v3190_v61, %v761_v41  ;;  %v789_v49 = vmul.f32 1.442695, %v768_v10 }
 0x2a9   : > { %2638 = vpow2.f32 %v779_v11  ;;  %v773_v55 = vsub.f32 %v3202_v4, %v761_v41  ;;  %v791_v53 = vmul.f32 1.442695, %v769_v13  ;;  %v775_v19 = vsub.f32 %v3222_v14, %v761_v41 }
 0x2aa   : > { %2640 = vpow2.f32 %v781_v12  ;;  %v793_v59 = vmul.f32 1.442695, %v770_v17  ;;  %v3297_v57 = vrot.slane %v3273_v40, %v3262_v34  ;;  %v776_v20 = vsub.f32 %v3206_v6, %v761_v41 }
 0x2ab   : > { %2642 = vpow2.f32 %v783_v16  ;;  %v795_v63 = vmul.f32 1.442695, %v771_v47  ;;  %v777_v22 = vsub.f32 %v3246_v36, %v761_v41  ;;  %v797_v61 = vmul.f32 1.442695, %v772_v51 }
 0x2ac   : > { %2644 = vpow2.f32 %v785_v18  ;;  %v778_v4 = vsub.f32 %v3236_v28, %v761_v41  ;;  %v799_v27 = vmul.f32 1.442695, %v773_v55  ;;  %v803_v14 = vmul.f32 1.442695, %v775_v19 }
 0x2ad   : > { %2646 = vpow2.f32 %v787_v45  ;;  %v1077_v30 = vsub.f32 %v3160_v48, %v3297_v57  ;;  %v805_v33 = vmul.f32 1.442695, %v776_v20  ;;  %v1078_v6 = vsub.f32 %v3156_v46, %v3297_v57  ;;  %v3348_v20 = vpop.trf.xlu0 }
 0x2ae   : > { %2648 = vpow2.f32 %v789_v49  ;;  %v774_v35 = vsub.f32 %v3198_v2, %v761_v41  ;;  %v807_v36 = vmul.f32 1.442695, %v777_v22  ;;  %v809_v43 = vmul.f32 1.442695, %v778_v4 }
 0x2af   : > { %2650 = vpow2.f32 %v791_v53  ;;  %v1079_v28 = vsub.f32 %v3168_v52, %v3297_v57  ;;  %v1080_v42 = vsub.f32 %v3164_v50, %v3297_v57  ;;  %v1093_v44 = vmul.f32 1.442695, %v1077_v30 }
 0x2b0   : > { %2652 = vpow2.f32 %v793_v59  ;;  %v1081_v46 = vsub.f32 %v3176_v56, %v3297_v57  ;;  %v1095_v8 = vmul.f32 1.442695, %v1078_v6  ;;  %v801_v41 = vmul.f32 1.442695, %v774_v35 }
 0x2b1   : > { %2654 = vpow2.f32 %v795_v63  ;;  %v1082_v9 = vsub.f32 %v3172_v54, %v3297_v57  ;;  %v1083_v50 = vsub.f32 %v3184_v60, %v3297_v57  ;;  %v1097_v10 = vmul.f32 1.442695, %v1079_v28 }
 0x2b2   : > { %2656 = vpow2.f32 %v797_v61  ;;  %v1085_v56 = vsub.f32 %v3196_v1, %v3297_v57  ;;  %v1099_v12 = vmul.f32 1.442695, %v1080_v42  ;;  %v1086_v54 = vsub.f32 %v3192_v62, %v3297_v57 }
 0x2b3   : > { %2658 = vpow2.f32 %v799_v27  ;;  %v1101_v17 = vmul.f32 1.442695, %v1081_v46  ;;  %v1087_v60 = vsub.f32 %v3204_v5, %v3297_v57  ;;  %v1103_v47 = vmul.f32 1.442695, %v1082_v9 }
 0x2b4   : > { %2660 = vpow2.f32 %v803_v14  ;;  %v1088_v51 = vsub.f32 %v3200_v3, %v3297_v57  ;;  %v1105_v49 = vmul.f32 1.442695, %v1083_v50  ;;  %v1109_v62 = vmul.f32 1.442695, %v1085_v56 }
 0x2b5   : > { %2662 = vpow2.f32 %v805_v33  ;;  %v1084_v5 = vsub.f32 %v3180_v58, %v3297_v57  ;;  %v1111_v59 = vmul.f32 1.442695, %v1086_v54  ;;  %v1091_v3 = vsub.f32 %v3248_v37, %v3297_v57 }
 0x2b6   : > { %v3311_v48 = vpop.eup %2638  ;;  %2664 = vpow2.f32 %v807_v36  ;;  %v1113_v22 = vmul.f32 1.442695, %v1087_v60  ;;  %v1092_v27 = vsub.f32 %v3238_v29, %v3297_v57  ;;  %v1115_v58 = vmul.f32 1.442695, %v1088_v51 }
 0x2b7   : > { %v3315_v2 = vpop.eup %2640  ;;  %2666 = vpow2.f32 %v809_v43  ;;  %v1089_v30 = vsub.f32 %v3224_v15, %v3297_v57  ;;  %v1090_v37 = vsub.f32 %v3208_v7, %v3297_v57  ;;  %v1107_v35 = vmul.f32 1.442695, %v1084_v5 }
 0x2b8   : > { %v811_v52 = vadd.f32 %v3315_v2, %v3311_v48  ;;  %v3323_v11 = vpop.eup %2642  ;;  %2668 = vpow2.f32 %v1093_v44  ;;  %v1121_v43 = vmul.f32 1.442695, %v1091_v3  ;;  %v1123_v42 = vmul.f32 1.442695, %v1092_v27  ;;  %v3365_v44 = vpop.trf.xlu0 }
 0x2b9   : > { %v3327_v13 = vpop.eup %2644  ;;  %2670 = vpow2.f32 %v1095_v8  ;;  %v1117_v46 = vmul.f32 1.442695, %v1089_v30  ;;  %v1119_v7 = vmul.f32 1.442695, %v1090_v37  ;;  %v754_v56 = vsub.f32 %v3257_v31, %v3270_v39 }
 0x2ba   : > { %v812_v16 = vadd.f32 %v3323_v11, %v811_v52  ;;  %v3332_v18 = vpop.eup %2646  ;;  %2672 = vpow2.f32 %v801_v41 }
 0x2bb   : > { %v3336_v45 = vpop.eup %2648  ;;  %2674 = vpow2.f32 %v1097_v10  ;;  %v755_v39 = vmul.f32 1.442695, %v754_v56 }
 0x2bc   : > { %v813_v1 = vadd.f32 %v3327_v13, %v812_v16  ;;  %v3341_v55 = vpop.eup %2650  ;;  %2676 = vpow2.f32 %v1099_v12 }
 0x2bd   : > { %v3343_v53 = vpop.eup %2652  ;;  %2678 = vpow2.f32 %v1101_v17 }
 0x2be   : > { %v814_v19 = vadd.f32 %v3332_v18, %v813_v1  ;;  %v3350_v63 = vpop.eup %2654  ;;  %2680 = vpow2.f32 %v1103_v47  ;;  %v3383_v47 = vpop.trf.xlu0 }
 0x2bf   : > { %v3354_v61 = vpop.eup %2656  ;;  %2682 = vpow2.f32 %v1105_v49 }
 0x2c0   : > { %v815_v4 = vadd.f32 %v3336_v45, %v814_v19  ;;  %v2659_v14 = vpop.eup %2658  ;;  %2684 = vpow2.f32 %v1109_v62 }
 0x2c1   : > { %v2661_v33 = vpop.eup %2660  ;;  %2686 = vpow2.f32 %v1111_v59 }
 0x2c2   : > { %v816_v6 = vadd.f32 %v3341_v55, %v815_v4  ;;  %v2663_v36 = vpop.eup %2662  ;;  %2688 = vpow2.f32 %v1113_v22 }
 0x2c3   : > { %v2665_v28 = vpop.eup %2664  ;;  %2690 = vpow2.f32 %v1115_v58  ;;  %v838_v60 = vpack.c.bf16 %v2663_v36, %v2661_v33 }
 0x2c4   : > { %v817_v29 = vadd.f32 %v3343_v53, %v816_v6  ;;  %v2667_v15 = vpop.eup %2666  ;;  %2692 = vpow2.f32 %v1107_v35  ;;  %v3401_v6 = vpop.trf.xlu0 }
 0x2c5   : > { %v3367_v8 = vpop.eup %2668  ;;  %v839_v57 = vpack.c.bf16 %v2667_v15, %v2665_v28  ;;  %2694 = vpow2.f32 %v1121_v43  ;;  %v836_v43 = vpack.c.bf16 %v3354_v61, %v3350_v63 }
 0x2c6   : > { %v818_v41 = vadd.f32 %v3350_v63, %v817_v29  ;;  %v3370_v9 = vpop.eup %2670  ;;  %2696 = vpow2.f32 %v1123_v42 }
 0x2c7   : > { %v2673_v52 = vpop.eup %2672  ;;  %v1125_v10 = vadd.f32 %v3370_v9, %v3367_v8  ;;  %2405 = vmatpush3.bf16.msra.mxu1 %v839_v57  ;;  %2698 = vpow2.f32 %v1117_v46 }
 0x2c8   : > { %v819_v50 = vadd.f32 %v3354_v61, %v818_v41  ;;  %v3377_v12 = vpop.eup %2674  ;;  %2406 = vmatprep.subr.bf16.mxu1 %v2924_v0  ;;  %2700 = vpow2.f32 %v1119_v7  ;;  %v837_v3 = vpack.c.bf16 %v2673_v52, %v2659_v14 }
 0x2c9   : > { %v3380_v16 = vpop.eup %2676  ;;  %v1126_v17 = vadd.f32 %v3377_v12, %v1125_v10  ;;  %2702 = vpow2.f32 %v755_v39  ;;  %v3411_v10 = vpop.trf.xlu0 }
 0x2ca   : > { %v820_v54 = vadd.f32 %v2659_v14, %v819_v50  ;;  %v3385_v1 = vpop.eup %2678 }
 0x2cb   : > { %v3387_v51 = vpop.eup %2680  ;;  %v1127_v31 = vadd.f32 %v3380_v16, %v1126_v17  ;;  %2407 = vmatpush3.bf16.msra.mxu1 %v838_v60 }
 0x2cc   : > { %v821_v49 = vadd.f32 %v2673_v52, %v820_v54  ;;  %v3390_v62 = vpop.eup %2682  ;;  %2408 = vmatprep.subr.bf16.mxu1 %v2924_v0 }
 0x2cd   : > { %v3393_v19 = vpop.eup %2684  ;;  %v1128_v59 = vadd.f32 %v3385_v1, %v1127_v31  ;;  %v3420_v31 = vpop.trf.xlu0 }
 0x2ce   : > { %v822_v5 = vadd.f32 %v2661_v33, %v821_v49  ;;  %v3396_v22 = vpop.eup %2686 }
 0x2cf   : > { %v2689_v4 = vpop.eup %2688  ;;  %v1129_v58 = vadd.f32 %v3387_v51, %v1128_v59  ;;  %2409 = vmatpush3.bf16.msra.mxu1 %v837_v3  ;;  %v1150_v30 = vpack.c.bf16 %v3396_v22, %v3393_v19  ;;  %v833_v59 = vpack.c.bf16 %v3327_v13, %v3323_v11  ;;  %v502_v11 = vpack.c.bf16 %v3114_v25, %v3114_v25 }
 0x2d0   : > { %v823_v27 = vadd.f32 %v2663_v36, %v822_v5  ;;  %v2691_v37 = vpop.eup %2690  ;;  %2410 = vmatprep.subr.bf16.mxu1 %v2924_v0  ;;  %v1148_v25 = vpack.c.bf16 %v3387_v51, %v3385_v1  ;;  %v1146_v1 = vpack.c.bf16 %v3370_v9, %v3367_v8 }
 0x2d1   : > { %v1130_v35 = vadd.f32 %v3390_v62, %v1129_v58  ;;  %v1151_v14 = vpack.c.bf16 %v2691_v37, %v2689_v4  ;;  %v2693_v36 = vpop.eup %2692 }
 0x2d2   : > { %v824_v33 = vadd.f32 %v2665_v28, %v823_v27  ;;  %v2695_v29 = vpop.eup %2694  ;;  %v835_v28 = vpack.c.bf16 %v3343_v53, %v3341_v55  ;;  %v834_v55 = vpack.c.bf16 %v3336_v45, %v3332_v18  ;;  %v3433_v27 = vpop.trf.xlu0 }
 0x2d3   : > { %v1131_v46 = vadd.f32 %v2693_v36, %v1130_v35  ;;  %2411 = vmatpush3.bf16.msra.mxu1 %v836_v43  ;;  %v2697_v41 = vpop.eup %2696 }
 0x2d4   : > { %v825_v42 = vadd.f32 %v2667_v15, %v824_v33  ;;  %2412 = vmatprep.subr.bf16.mxu1 %v2924_v0  ;;  %v2699_v7 = vpop.eup %2698  ;;  %v1153_v50 = vpack.c.bf16 %v2697_v41, %v2695_v29  ;;  %v1068_v15 = vsub.f32 %v3259_v32, %v3273_v40  ;;  %v840_v32 = vld [vmem:[#allocation5] sm:$0x1]  ;;  %v1149_v33 = vpack.c.bf16 %v2693_v36, %v3390_v62  ;;  %v1154_v62 = vld [vmem:[#allocation5 + $0x1] sm:$0x1] }
 0x2d5   : > { %v1132_v52 = vadd.f32 %v3393_v19, %v1131_v46  ;;  %v2701_v56 = vpop.eup %2700  ;;  %v1147_v36 = vpack.c.bf16 %v3380_v16, %v3377_v12 }
 0x2d6   : > { %v826_v57 = vrot.slane %v825_v42, 4  ;;  %2451 = vmatpush3.bf16.msra.mxu0 %v1153_v50  ;;  %v1152_v60 = vpack.c.bf16 %v2701_v56, %v2699_v7  ;;  %v1069_v39 = vmul.f32 1.442695, %v1068_v15  ;;  %v3422_v19 = vpop.eup %2702 }
 0x2d7   : > { %v1133_v61 = vadd.f32 %v3396_v22, %v1132_v52  ;;  %2413 = vmatpush3.bf16.msra.mxu1 %v835_v28  ;;  %2452 = vmatprep.subr.bf16.mxu0 %v2924_v0  ;;  %v841_v3 = vmul.f32 %v3422_v19, %v840_v32 }
 0x2d8   : > { %v827_v63 = vadd.f32 %v826_v57, %v825_v42  ;;  %2414 = vmatprep.subr.bf16.mxu1 %v2924_v0  ;;  %2704 = vpow2.f32 %v1069_v39 }
 0x2d9   : > { %v1134_v17 = vadd.f32 %v2689_v4, %v1133_v61  ;;  %v832_v4 = vpack.c.bf16 %v3315_v2, %v3311_v48  ;;  %v1233_v2 = vpop.trf.xlu0 }
 0x2da   : > { %v828_v54 = vrot.slane %v827_v63, 2  ;;  %2453 = vmatpush3.bf16.msra.mxu0 %v1152_v60 }
 0x2db   : > { %v1135_v49 = vadd.f32 %v2691_v37, %v1134_v17  ;;  %2415 = vmatpush3.bf16.msra.mxu1 %v834_v55  ;;  %2454 = vmatprep.subr.bf16.mxu0 %v2924_v0 }
 0x2dc   : > { %v829_v53 = vadd.f32 %v828_v54, %v827_v63  ;;  %2416 = vmatprep.subr.bf16.mxu1 %v2924_v0 }
 0x2dd   : > { %v1136_v5 = vadd.f32 %v2699_v7, %v1135_v49 }
 0x2de   : > { %v830_v40 = vrot.slane %v829_v53, 1  ;;  %2455 = vmatpush3.bf16.msra.mxu0 %v1151_v14 }
 0x2df   : > { %v1137_v45 = vadd.f32 %v2701_v56, %v1136_v5  ;;  %2417 = vmatpush3.bf16.msra.mxu1 %v833_v59  ;;  %2456 = vmatprep.subr.bf16.mxu0 %v2924_v0 }
 0x2e0   : > { %v831_v18 = vadd.f32 %v830_v40, %v829_v53  ;;  %2418 = vmatprep.subr.bf16.mxu1 %v2924_v0 }
 0x2e1   : > { %v1138_v22 = vadd.f32 %v2695_v29, %v1137_v45  ;;  %v1234_v29 = vpop.trf.xlu0 }
 0x2e2   : > { %v842_v58 = vadd.f32 %v841_v3, %v831_v18  ;;  %2457 = vmatpush3.bf16.msra.mxu0 %v1150_v30 }
 0x2e3   : > { %v1139_v37 = vadd.f32 %v2697_v41, %v1138_v22  ;;  %2419 = vmatpush3.bf16.msra.mxu1 %v832_v4  ;;  %2458 = vmatprep.subr.bf16.mxu0 %v2924_v0 }
 0x2e4   : > { %847 = vst.msk [vmem:[#allocation5] sm:$0x1] %vm3265_vm4, %v842_v58  ;;  %2496 = vmatprep.subr.bf16.mxu1 %v2924_v0 }
 0x2e5   : > { %v1140_v13 = vrot.slane %v1139_v37, 4  ;;  %v3447_v14 = vpop.eup %2704  ;;  %v1235_v41 = vpop.trf.xlu0 }
 0x2e6   : > { %2421 = vmatmul.mubr.bf16.vlgmr.msra.gmra.mxu1 %v502_v11  ;;  %2459 = vmatpush3.bf16.msra.mxu0 %v1149_v33  ;;  %v1155_v46 = vmul.f32 %v3447_v14, %v1154_v62  ;;  %v1163_v50 = vrot.slane %v3447_v14, %v3262_v34 }
 0x2e7   : > { %v1141_v48 = vadd.f32 %v1140_v13, %v1139_v37  ;;  %2512 = vmatprep.mubr.msk.bf16.mxu1 %vm2926_vm3, %v2924_v0  ;;  %2460 = vmatprep.subr.bf16.mxu0 %v2924_v0 }
 0x2e8   : > { %v1165_v28 = vmul.f32 0.0, %v1163_v50 }
 0x2e9   : > { %v1142_v30 = vrot.slane %v1141_v48, 2  ;;  %v1236_v12 = vpop.trf.xlu0 }
 0x2ea   : > { %2461 = vmatpush3.bf16.msra.mxu0 %v1148_v25 }
 0x2eb   : > { %v1143_v35 = vadd.f32 %v1142_v30, %v1141_v48  ;;  %2462 = vmatprep.subr.bf16.mxu0 %v2924_v0 }
 0x2ed   : > { %v1144_v43 = vrot.slane %v1143_v35, 1  ;;  %v1237_v8 = vpop.trf.xlu0 }
 0x2ee   : > { %2463 = vmatpush3.bf16.msra.mxu0 %v1147_v36 }
 0x2ef   : > { %v1145_v42 = vadd.f32 %v1144_v43, %v1143_v35  ;;  %2464 = vmatprep.subr.bf16.mxu0 %v2924_v0 }
 0x2f1   : > { %v1156_v51 = vadd.f32 %v1155_v46, %v1145_v42 }
 0x2f2   : > { %2465 = vmatpush3.bf16.msra.mxu0 %v1146_v1 }
 0x2f3   : > { %1157 = vst.msk [vmem:[#allocation5 + $0x1] sm:$0x1] %vm3265_vm4, %v1156_v51  ;;  %2470 = vmatprep.subr.mxu0 %v3104_v23 }
 0x2f5   : > { %2467 = vmatmul.mubr.bf16.vlgmr.msra.gmra.mxu0 %v502_v11 }
 0x2f6   : > { %2471 = vmatpush3.msra.mxu0 %v3104_v23  ;;  %2472 = vmatprep.mubr.msk.f32.mxu0 %vm537_vm1, %v3348_v20  ;;  %v1238_v23 = vpop.trf.xlu0 }
 0x2f7   : > { %2516 = vmatprep.subr.mxu0 %v3107_v24 }
 0x2fd   : > { %2473 = vmatmul.mubr.msk.f32.vlgmr.msra.gmra.mxu0 %vm537_vm1, %v3365_v44 }
 0x2fe   : > { %2517 = vmatpush3.msra.mxu0 %v3107_v24  ;;  %2475 = vmatprep.mubr.msk.f32.mxu0 %vm537_vm1, %v3383_v47  ;;  %v1239_v24 = vpop.trf.xlu0 }
 0x301   : > { %2476 = vmatmul.mubr.msk.f32.gmra.mxu0 %vm537_vm1, %v3401_v6 }
 0x302   : > { %2478 = vmatprep.mubr.msk.f32.mxu0 %vm537_vm1, %v3411_v10  ;;  %v1240_v9 = vpop.trf.xlu0 }
 0x305   : > { %2479 = vmatmul.mubr.msk.f32.gmra.mxu0 %vm537_vm1, %v3420_v31 }
 0x306   : > { %2481 = vmatprep.mubr.msk.f32.mxu0 %vm537_vm1, %v3433_v27  ;;  %v1241_v16 = vpop.trf.xlu0 }
 0x309   : > { %2482 = vmatmul.mubr.msk.f32.gmra.mxu0 %vm537_vm1, %v1233_v2 }
 0x30a   : > { %2484 = vmatprep.mubr.msk.f32.mxu0 %vm537_vm1, %v1234_v29 }
 0x30d   : > { %2485 = vmatmul.mubr.msk.f32.gmra.mxu0 %vm537_vm1, %v1235_v41 }
 0x30e   : > { %2487 = vmatprep.mubr.msk.f32.mxu0 %vm537_vm1, %v1236_v12 }
 0x311   : > { %2488 = vmatmul.mubr.msk.f32.gmra.mxu0 %vm537_vm1, %v1237_v8 }
 0x312   : > { %2490 = vmatprep.mubr.msk.f32.mxu0 %vm537_vm1, %v1238_v23 }
 0x315   : > { %2491 = vmatmul.mubr.msk.f32.gmra.mxu0 %vm537_vm1, %v1239_v24 }
 0x316   : > { %2493 = vmatprep.mubr.msk.f32.mxu0 %vm537_vm1, %v1240_v9 }
 0x319   : > { %2494 = vmatmul.mubr.msk.f32.gmra.mxu0 %vm537_vm1, %v1241_v16 }
 0x31a   : > { %2518 = vmatprep.mubr.msk.f32.mxu0 %vm537_vm1, %v3348_v20  ;;  %v853_v20 = vrot.slane %v3422_v19, %v3262_v34 }
 0x31d   : > { %2519 = vmatmul.mubr.msk.f32.vlgmr.msra.gmra.mxu0 %vm537_vm1, %v3365_v44  ;;  %v855_v44 = vmul.f32 0.0, %v853_v20  ;;  %v3572_v20 = vld [vmem:[#allocation4] sm:$0x1] }
 0x31e   : > { %2521 = vmatprep.mubr.msk.f32.mxu0 %vm537_vm1, %v3383_v47 }
 0x321   : > { %2522 = vmatmul.mubr.msk.f32.gmra.mxu0 %vm537_vm1, %v3401_v6 }
 0x322   : > { %2524 = vmatprep.mubr.msk.f32.mxu0 %vm537_vm1, %v3411_v10 }
 0x325   : > { %2525 = vmatmul.mubr.msk.f32.gmra.mxu0 %vm537_vm1, %v3420_v31 }
 0x326   : > { %2527 = vmatprep.mubr.msk.f32.mxu0 %vm537_vm1, %v3433_v27 }
 0x329   : > { %2528 = vmatmul.mubr.msk.f32.gmra.mxu0 %vm537_vm1, %v1233_v2 }
 0x32a   : > { %2530 = vmatprep.mubr.msk.f32.mxu0 %vm537_vm1, %v1234_v29 }
 0x32d   : > { %2531 = vmatmul.mubr.msk.f32.gmra.mxu0 %vm537_vm1, %v1235_v41 }
 0x32e   : > { %2533 = vmatprep.mubr.msk.f32.mxu0 %vm537_vm1, %v1236_v12 }
 0x331   : > { %2534 = vmatmul.mubr.msk.f32.gmra.mxu0 %vm537_vm1, %v1237_v8 }
 0x332   : > { %2536 = vmatprep.mubr.msk.f32.mxu0 %vm537_vm1, %v1238_v23 }
 0x335   : > { %2537 = vmatmul.mubr.msk.f32.gmra.mxu0 %vm537_vm1, %v1239_v24 }
 0x336   : > { %2539 = vmatprep.mubr.msk.f32.mxu0 %vm537_vm1, %v1240_v9 }
 0x339   : > { %2540 = vmatmul.mubr.msk.f32.gmra.mxu0 %vm537_vm1, %v1241_v16 }
 0x33a   : > { %2017 = vmatprep.mubr.f32.mxu0 %v2924_v0 }
 0x3a6   : > { %v890_v47 = vpop.f32.mrf.mxu1 }
 0x3a7   : > { %v3511_v6 = vadd.f32 %v890_v47, %v855_v44 }
 0x3a8   : > { %v2422_v7 = vpop.f32.mrf.mxu1 }
 0x3aa   : > { %v893_v57 = vpop.f32.mrf.mxu1 }
 0x3ac   : > { %v2423_v52 = vpop.f32.mrf.mxu1 }
 0x3b5   : > { %v1200_v10 = vpop.f32.mrf.mxu0 }
 0x3b6   : > { %v3515_v56 = vadd.f32 %v1200_v10, %v1165_v28 }
 0x3b7   : > { %v2468_v63 = vpop.f32.mrf.mxu0 }
 0x3b9   : > { %v1203_v61 = vpop.f32.mrf.mxu0 }
 0x3bb   : > { %v2469_v15 = vpop.f32.mrf.mxu0 }
 0x3bd   : > { %v2474_v54 = vpop.f32.mrf.mxu0 }
 0x3bf   : > { %v1356_v17 = vpop.f32.mrf.mxu0 }
 0x3c1   : > { %v3517_v60 = vpop.f32.mrf.mxu0 }
 0x3c3   : > { %v1366_v55 = vpop.f32.mrf.mxu0 }
 0x3c5   : > { %v3519_v53 = vpop.f32.mrf.mxu0 }
 0x3c6   : > { %v1437_v3 = vmax.f32 %v2474_v54, %v3519_v53 }
 0x3c7   : > { %v3521_v49 = vpop.f32.mrf.mxu0 }
 0x3c8   : > { %v1436_v18 = vmax.f32 %v1356_v17, %v3521_v49 }
 0x3c9   : > { %v3523_v31 = vpop.f32.mrf.mxu0 }
 0x3ca   : > { %v1439_v22 = vmax.f32 %v3517_v60, %v3523_v31 }
 0x3cb   : > { %v3525_v39 = vpop.f32.mrf.mxu0 }
 0x3cc   : > { %v1438_v4 = vmax.f32 %v1366_v55, %v3525_v39 }
 0x3cd   : > { %v3527_v19 = vpop.f32.mrf.mxu0 }
 0x3ce   : > { %v1441_v37 = vmax.f32 %v1437_v3, %v3527_v19 }
 0x3cf   : > { %v3529_v32 = vpop.f32.mrf.mxu0 }
 0x3d0   : > { %v1440_v27 = vmax.f32 %v1436_v18, %v3529_v32 }
 0x3d1   : > { %v3531_v40 = vpop.f32.mrf.mxu0 }
 0x3d2   : > { %v1443_v11 = vmax.f32 %v1439_v22, %v3531_v40 }
 0x3d3   : > { %v3533_v5 = vpop.f32.mrf.mxu0 }
 0x3d4   : > { %v1442_v13 = vmax.f32 %v1438_v4, %v3533_v5 }
 0x3d5   : > { %v3535_v59 = vpop.f32.mrf.mxu0 }
 0x3d6   : > { %v1445_v2 = vmax.f32 %v1441_v37, %v3535_v59 }
 0x3d7   : > { %v3538_v45 = vpop.f32.mrf.mxu0 }
 0x3d8   : > { %v1444_v33 = vmax.f32 %v1440_v27, %v3538_v45 }
 0x3d9   : > { %v3545_v58 = vpop.f32.mrf.mxu0 }
 0x3da   : > { %v1447_v30 = vmax.f32 %v1443_v11, %v3545_v58  ;;  %v1448_v14 = vmax.f32 %v1444_v33, %v1445_v2 }
 0x3db   : > { %v3551_v48 = vpop.f32.mrf.mxu0 }
 0x3dc   : > { %v1446_v25 = vmax.f32 %v1442_v13, %v3551_v48 }
 0x3dd   : > { %v3556_v35 = vpop.f32.mrf.mxu0 }
 0x3de   : > { %v1449_v62 = vmax.f32 %v1446_v25, %v1447_v30 }
 0x3df   : > { %v3558_v43 = vpop.f32.mrf.mxu0 }
 0x3e0   : > { %v1450_v36 = vmax.f32 %v1448_v14, %v1449_v62 }
 0x3e1   : > { %v3560_v29 = vpop.f32.mrf.mxu0 }
 0x3e2   : > { %v1451_v42 = vrot.slane %v1450_v36, 4 }
 0x3e3   : > { %v3562_v46 = vpop.f32.mrf.mxu0 }
 0x3e4   : > { %v1452_v1 = vmax.f32 %v1450_v36, %v1451_v42 }
 0x3e5   : > { %v3564_v51 = vpop.f32.mrf.mxu0 }
 0x3e6   : > { %v1453_v41 = vrot.slane %v1452_v1, 2 }
 0x3e7   : > { %v3566_v12 = vpop.f32.mrf.mxu0 }
 0x3e8   : > { %v1454_v8 = vmax.f32 %v1452_v1, %v1453_v41 }
 0x3e9   : > { %v3568_v23 = vpop.f32.mrf.mxu0 }
 0x3ea   : > { %v1455_v24 = vrot.slane %v1454_v8, 1  ;;  %v1749_v37 = vmax.f32 %v3560_v29, %v3568_v23 }
 0x3eb   : > { %v3570_v9 = vpop.f32.mrf.mxu0 }
 0x3ec   : > { %v1456_v16 = vmax.f32 %v1454_v8, %v1455_v24 }
 0x3ed   : > { %v3574_v44 = vpop.f32.mrf.mxu0 }
 0x3ee   : > { %v3577_v47 = vmax.f32 %v3572_v20, %v1456_v16 }
 0x3ef   : > { %v3579_v7 = vpop.f32.mrf.mxu0 }
 0x3f0   : > { %v3583_v57 = vrot.slane %v3577_v47, %v3262_v34  ;;  %1598 = vst.msk [vmem:[#allocation4] sm:$0x1] %vm3265_vm4, %v3577_v47 }
 0x3f1   : > { %v3588_v52 = vpop.f32.mrf.mxu0 }
 0x3f2   : > { %v1467_v50 = vsub.f32 %v1356_v17, %v3583_v57  ;;  %v1468_v28 = vsub.f32 %v2474_v54, %v3583_v57  ;;  %v1469_v10 = vsub.f32 %v1366_v55, %v3583_v57  ;;  %v1470_v61 = vsub.f32 %v3517_v60, %v3583_v57 }
 0x3f3   : > { %v3593_v63 = vpop.f32.mrf.mxu0  ;;  %v1471_v22 = vsub.f32 %v3521_v49, %v3583_v57  ;;  %v1472_v54 = vsub.f32 %v3519_v53, %v3583_v57  ;;  %v1747_v17 = vmax.f32 %v3556_v35, %v3564_v51  ;;  %v1746_v60 = vmax.f32 %v3558_v43, %v3566_v12 }
 0x3f4   : > { %v1483_v18 = vmul.f32 1.442695, %v1467_v50  ;;  %v1485_v3 = vmul.f32 1.442695, %v1468_v28  ;;  %v1487_v4 = vmul.f32 1.442695, %v1469_v10  ;;  %v1748_v49 = vmax.f32 %v3562_v46, %v3570_v9 }
 0x3f5   : > { %v3597_v15 = vpop.f32.mrf.mxu0  ;;  %v1489_v55 = vmul.f32 1.442695, %v1470_v61  ;;  %v1473_v53 = vsub.f32 %v3525_v39, %v3583_v57  ;;  %v1751_v13 = vmax.f32 %v1747_v17, %v3574_v44  ;;  %v1750_v33 = vmax.f32 %v1746_v60, %v3579_v7 }
 0x3f6   : > { %2706 = vpow2.f32 %v1483_v18  ;;  %v1491_v2 = vmul.f32 1.442695, %v1471_v22  ;;  %v1753_v30 = vmax.f32 %v1749_v37, %v3588_v52  ;;  %v1752_v25 = vmax.f32 %v1748_v49, %v3593_v63 }
 0x3f7   : > { %v3601_v27 = vpop.f32.mrf.mxu0  ;;  %2708 = vpow2.f32 %v1485_v3  ;;  %v1474_v62 = vsub.f32 %v3523_v31, %v3583_v57  ;;  %v1493_v36 = vmul.f32 1.442695, %v1472_v54  ;;  %v1755_v39 = vmax.f32 %v1751_v13, %v3597_v15 }
 0x3f8   : > { %2710 = vpow2.f32 %v1487_v4  ;;  %v1754_v42 = vmax.f32 %v1750_v33, %v3601_v27  ;;  %v1475_v8 = vsub.f32 %v3529_v32, %v3583_v57  ;;  %v1495_v24 = vmul.f32 1.442695, %v1473_v53 }
 0x3f9   : > { %v3613_v11 = vpop.f32.mrf.mxu0  ;;  %2712 = vpow2.f32 %v1489_v55  ;;  %v1476_v31 = vsub.f32 %v3527_v19, %v3583_v57  ;;  %v1497_v28 = vmul.f32 1.442695, %v1474_v62  ;;  %v1477_v61 = vsub.f32 %v3533_v5, %v3583_v57 }
 0x3fa   : > { %v1757_v1 = vmax.f32 %v1753_v30, %v3613_v11  ;;  %2714 = vpow2.f32 %v1491_v2  ;;  %v1758_v16 = vmax.f32 %v1754_v42, %v1755_v39  ;;  %v1478_v18 = vsub.f32 %v3531_v40, %v3583_v57 }
 0x3fb   : > { %v3621_v14 = vpop.f32.mrf.mxu0  ;;  %2716 = vpow2.f32 %v1493_v36  ;;  %v1499_v3 = vmul.f32 1.442695, %v1475_v8  ;;  %v1479_v32 = vsub.f32 %v3538_v45, %v3583_v57  ;;  %v1481_v19 = vsub.f32 %v3551_v48, %v3583_v57 }
 0x3fc   : > { %v1756_v41 = vmax.f32 %v1752_v25, %v3621_v14  ;;  %2718 = vpow2.f32 %v1495_v24  ;;  %v1501_v54 = vmul.f32 1.442695, %v1476_v31  ;;  %v1458_v5 = vsub.f32 %v3572_v20, %v3577_v47 }
 0x3fd   : > { %2720 = vpow2.f32 %v1497_v28  ;;  %v1482_v40 = vsub.f32 %v3545_v58, %v3583_v57  ;;  %v1503_v55 = vmul.f32 1.442695, %v1477_v61  ;;  %v1505_v37 = vmul.f32 1.442695, %v1478_v18 }
 0x3fe   : > { %v1759_v50 = vmax.f32 %v1756_v41, %v1757_v1  ;;  %2722 = vpow2.f32 %v1499_v3  ;;  %v1480_v13 = vsub.f32 %v3535_v59, %v3583_v57  ;;  %v1507_v33 = vmul.f32 1.442695, %v1479_v32  ;;  %v1745_v41 = vld [vmem:[#allocation4 + $0x1] sm:$0x1] }
 0x3ff   : > { %2724 = vpow2.f32 %v1501_v54  ;;  %v1511_v20 = vmul.f32 1.442695, %v1481_v19  ;;  %v1513_v30 = vmul.f32 1.442695, %v1482_v40  ;;  %v1459_v25 = vmul.f32 1.442695, %v1458_v5 }
 0x400   : > { %v1760_v10 = vmax.f32 %v1758_v16, %v1759_v50  ;;  %2726 = vpow2.f32 %v1503_v55  ;;  %v1509_v39 = vmul.f32 1.442695, %v1480_v13 }
 0x401   : > { %2728 = vpow2.f32 %v1505_v37 }
 0x402   : > { %v1761_v22 = vrot.slane %v1760_v10, 4  ;;  %2730 = vpow2.f32 %v1507_v33 }
 0x403   : > { %v3639_v4 = vpop.eup %2706  ;;  %2732 = vpow2.f32 %v1511_v20 }
 0x404   : > { %v1762_v17 = vmax.f32 %v1760_v10, %v1761_v22  ;;  %v3643_v60 = vpop.eup %2708  ;;  %2734 = vpow2.f32 %v1513_v30 }
 0x405   : > { %v1515_v45 = vadd.f32 %v3643_v60, %v3639_v4  ;;  %v1536_v48 = vpack.c.bf16 %v3643_v60, %v3639_v4  ;;  %v3653_v53 = vpop.eup %2710  ;;  %2736 = vpow2.f32 %v1459_v25 }
 0x406   : > { %v1763_v49 = vrot.slane %v1762_v17, 2  ;;  %v3658_v2 = vpop.eup %2712  ;;  %2738 = vpow2.f32 %v1509_v39 }
 0x407   : > { %v1516_v58 = vadd.f32 %v3653_v53, %v1515_v45  ;;  %v3661_v42 = vpop.eup %2714 }
 0x408   : > { %v1764_v47 = vmax.f32 %v1762_v17, %v1763_v49  ;;  %v3664_v1 = vpop.eup %2716 }
 0x409   : > { %v1517_v62 = vadd.f32 %v3658_v2, %v1516_v58  ;;  %v3667_v16 = vpop.eup %2718 }
 0x40a   : > { %v1765_v36 = vrot.slane %v1764_v47, 1  ;;  %v3675_v10 = vpop.eup %2720 }
 0x40b   : > { %v1518_v59 = vadd.f32 %v3661_v42, %v1517_v62  ;;  %v3678_v3 = vpop.eup %2722 }
 0x40c   : > { %v1766_v57 = vmax.f32 %v1764_v47, %v1765_v36  ;;  %v3687_v17 = vpop.eup %2724 }
 0x40d   : > { %v1519_v8 = vadd.f32 %v3664_v1, %v1518_v59  ;;  %v2727_v5 = vpop.eup %2726 }
 0x40e   : > { %v1767_v24 = vmax.f32 %v1745_v41, %v1766_v57  ;;  %v2729_v37 = vpop.eup %2728 }
 0x40f   : > { %v1520_v50 = vadd.f32 %v3667_v16, %v1519_v8  ;;  %v2731_v49 = vpop.eup %2730 }
 0x410   : > { %v1768_v31 = vsub.f32 %v1745_v41, %v1767_v24  ;;  %v3671_v28 = vrot.slane %v1767_v24, %v3262_v34  ;;  %1908 = vst.msk [vmem:[#allocation4 + $0x1] sm:$0x1] %vm3265_vm4, %v1767_v24  ;;  %v2733_v20 = vpop.eup %2732 }
 0x411   : > { %v1521_v61 = vadd.f32 %v3675_v10, %v1520_v50 }
 0x412   : > { %v1769_v18 = vmul.f32 1.442695, %v1768_v31  ;;  %v1777_v22 = vsub.f32 %v3558_v43, %v3671_v28  ;;  %v1778_v32 = vsub.f32 %v3556_v35, %v3671_v28  ;;  %v1779_v54 = vsub.f32 %v3562_v46, %v3671_v28  ;;  %v2735_v46 = vpop.eup %2734 }
 0x413   : > { %v1522_v19 = vadd.f32 %v3678_v3, %v1521_v61  ;;  %v1780_v55 = vsub.f32 %v3560_v29, %v3671_v28  ;;  %v1781_v35 = vsub.f32 %v3566_v12, %v3671_v28  ;;  %v1782_v47 = vsub.f32 %v3564_v51, %v3671_v28  ;;  %v3696_v25 = vpop.eup %2736 }
 0x414   : > { %2740 = vpow2.f32 %v1769_v18  ;;  %v1793_v45 = vmul.f32 1.442695, %v1777_v22  ;;  %v1795_v43 = vmul.f32 1.442695, %v1778_v32  ;;  %v1797_v33 = vmul.f32 1.442695, %v1779_v54  ;;  %v2739_v39 = vpop.eup %2738 }
 0x415   : > { %v1523_v40 = vadd.f32 %v3687_v17, %v1522_v19  ;;  %v1799_v30 = vmul.f32 1.442695, %v1780_v55  ;;  %v1783_v62 = vsub.f32 %v3570_v9, %v3671_v28  ;;  %v1801_v36 = vmul.f32 1.442695, %v1781_v35 }
 0x416   : > { %2742 = vpow2.f32 %v1793_v45  ;;  %v1784_v12 = vsub.f32 %v3568_v23, %v3671_v28  ;;  %v1543_v59 = vpack.c.bf16 %v2735_v46, %v2733_v20  ;;  %v1803_v41 = vmul.f32 1.442695, %v1782_v47 }
 0x417   : > { %v1524_v13 = vadd.f32 %v2727_v5, %v1523_v40  ;;  %2744 = vpow2.f32 %v1795_v43  ;;  %v1553_v51 = vrot.slane %v3696_v25, %v3262_v34  ;;  %v1785_v8 = vsub.f32 %v3579_v7, %v3671_v28 }
 0x418   : > { %2746 = vpow2.f32 %v1797_v33  ;;  %2497 = vmatpush3.bf16.msra.mxu1 %v1543_v59  ;;  %v1805_v9 = vmul.f32 1.442695, %v1783_v62  ;;  %v1786_v31 = vsub.f32 %v3574_v44, %v3671_v28  ;;  %v1791_v61 = vsub.f32 %v3621_v14, %v3671_v28 }
 0x419   : > { %v1525_v58 = vadd.f32 %v2729_v37, %v1524_v13  ;;  %2748 = vpow2.f32 %v1799_v30  ;;  %2498 = vmatprep.subr.bf16.mxu1 %v2924_v0  ;;  %v3708_v50 = vmul.f32 %v1553_v51, %v3511_v6  ;;  %v1542_v18 = vpack.c.bf16 %v2739_v39, %v2731_v49 }
 0x41a   : > { %2750 = vpow2.f32 %v1801_v36  ;;  %v1807_v7 = vmul.f32 1.442695, %v1784_v12  ;;  %v1787_v19 = vsub.f32 %v3593_v63, %v3671_v28  ;;  %v1792_v6 = vsub.f32 %v3613_v11, %v3671_v28 }
 0x41b   : > { %v1526_v29 = vadd.f32 %v2731_v49, %v1525_v58  ;;  %2752 = vpow2.f32 %v1803_v41  ;;  %v1809_v44 = vmul.f32 1.442695, %v1785_v8  ;;  %v1811_v40 = vmul.f32 1.442695, %v1786_v31 }
 0x41c   : > { %2499 = vmatpush3.bf16.msra.mxu1 %v1542_v18  ;;  %2754 = vpow2.f32 %v1805_v9  ;;  %v1541_v55 = vpack.c.bf16 %v2729_v37, %v2727_v5  ;;  %v1788_v63 = vsub.f32 %v3588_v52, %v3671_v28  ;;  %v1821_v49 = vmul.f32 1.442695, %v1791_v61 }
 0x41d   : > { %v1527_v57 = vadd.f32 %v2739_v39, %v1526_v29  ;;  %2500 = vmatprep.subr.bf16.mxu1 %v2924_v0  ;;  %2756 = vpow2.f32 %v1807_v7  ;;  %v1789_v13 = vsub.f32 %v3601_v27, %v3671_v28  ;;  %v1823_v35 = vmul.f32 1.442695, %v1792_v6 }
 0x41e   : > { %2758 = vpow2.f32 %v1809_v44  ;;  %v1790_v52 = vsub.f32 %v3597_v15, %v3671_v28  ;;  %v1537_v9 = vpack.c.bf16 %v3658_v2, %v3653_v53  ;;  %v503_v6 = vpack.c.bf16 %v3117_v26, %v3117_v26 }
 0x41f   : > { %v1528_v24 = vadd.f32 %v2733_v20, %v1527_v57  ;;  %2760 = vpow2.f32 %v1811_v40  ;;  %v1540_v20 = vpack.c.bf16 %v3687_v17, %v3678_v3  ;;  %v1817_v29 = vmul.f32 1.442695, %v1789_v13  ;;  %v1544_v17 = vld [vmem:[#allocation5] sm:$0x1] }
 0x420   : > { %2501 = vmatpush3.bf16.msra.mxu1 %v1541_v55  ;;  %2762 = vpow2.f32 %v1821_v49  ;;  %v1819_v28 = vmul.f32 1.442695, %v1790_v52  ;;  %v1539_v3 = vpack.c.bf16 %v3675_v10, %v3667_v16  ;;  %v1545_v12 = vmul.f32 %v3696_v25, %v1544_v17 }
 0x421   : > { %v3710_v23 = vpop.eup %2740  ;;  %v1529_v22 = vadd.f32 %v2735_v46, %v1528_v24  ;;  %2502 = vmatprep.subr.bf16.mxu1 %v2924_v0  ;;  %v1815_v46 = vmul.f32 1.442695, %v1788_v63  ;;  %2764 = vpow2.f32 %v1823_v35  ;;  %v1538_v16 = vpack.c.bf16 %v3664_v1, %v3661_v42 }
 0x422   : > { %v1863_v32 = vrot.slane %v3710_v23, %v3262_v34 }
 0x423   : > { %v1530_v54 = vrot.slane %v1529_v22, 4  ;;  %v3726_v45 = vpop.eup %2742 }
 0x424   : > { %v3724_v14 = vmul.f32 %v1863_v32, %v3515_v56  ;;  %v3730_v11 = vpop.eup %2744  ;;  %v1813_v56 = vmul.f32 1.442695, %v1787_v19  ;;  %2503 = vmatpush3.bf16.msra.mxu1 %v1540_v20 }
 0x425   : > { %v1531_v43 = vadd.f32 %v1530_v54, %v1529_v22  ;;  %v1825_v5 = vadd.f32 %v3730_v11, %v3726_v45  ;;  %v3737_v37 = vpop.eup %2746  ;;  %2504 = vmatprep.subr.bf16.mxu1 %v2924_v0 }
 0x426   : > { %v3744_v47 = vpop.eup %2748  ;;  %2766 = vpow2.f32 %v1813_v56  ;;  %v1854_v56 = vld [vmem:[#allocation5 + $0x1] sm:$0x1] }
 0x427   : > { %v1532_v33 = vrot.slane %v1531_v43, 2  ;;  %v1826_v58 = vadd.f32 %v3737_v37, %v1825_v5  ;;  %v3748_v15 = vpop.eup %2750  ;;  %2768 = vpow2.f32 %v1815_v46  ;;  %v1855_v52 = vmul.f32 %v3710_v23, %v1854_v56 }
 0x428   : > { %v3754_v59 = vpop.eup %2752  ;;  %2505 = vmatpush3.bf16.msra.mxu1 %v1539_v3  ;;  %2770 = vpow2.f32 %v1817_v29  ;;  %v1847_v46 = vpack.c.bf16 %v3744_v47, %v3737_v37  ;;  %v1846_v23 = vpack.c.bf16 %v3730_v11, %v3726_v45 }
 0x429   : > { %v1533_v27 = vadd.f32 %v1532_v33, %v1531_v43  ;;  %v1827_v62 = vadd.f32 %v3744_v47, %v1826_v58  ;;  %2506 = vmatprep.subr.bf16.mxu1 %v2924_v0  ;;  %v2755_v51 = vpop.eup %2754  ;;  %2772 = vpow2.f32 %v1819_v28  ;;  %v1848_v20 = vpack.c.bf16 %v3754_v59, %v3748_v15 }
 0x42a   : > { %v2757_v8 = vpop.eup %2756 }
 0x42b   : > { %v1534_v30 = vrot.slane %v1533_v27, 1  ;;  %v1828_v39 = vadd.f32 %v3748_v15, %v1827_v62  ;;  %v2759_v24 = vpop.eup %2758  ;;  %v1849_v35 = vpack.c.bf16 %v2757_v8, %v2755_v51 }
 0x42c   : > { %2507 = vmatpush3.bf16.msra.mxu1 %v1538_v16  ;;  %v2761_v31 = vpop.eup %2760 }
 0x42d   : > { %v1535_v36 = vadd.f32 %v1534_v30, %v1533_v27  ;;  %v1829_v57 = vadd.f32 %v3754_v59, %v1828_v39  ;;  %2508 = vmatprep.subr.bf16.mxu1 %v2924_v0  ;;  %v2763_v18 = vpop.eup %2762  ;;  %v1850_v63 = vpack.c.bf16 %v2761_v31, %v2759_v24  ;;  %v1929_v59 = vld [vmem:[%s3881_s4] sm:$0xff] }
 0x42e   : > { %v2765_v22 = vpop.eup %2764 }
 0x42f   : > { %v1546_v41 = vadd.f32 %v1545_v12, %v1535_v36  ;;  %v1830_v10 = vadd.f32 %v2755_v51, %v1829_v57  ;;  %v1853_v19 = vpack.c.bf16 %v2765_v22, %v2763_v18  ;;  %v1933_v57 = vld [vmem:[%s3074_s13] sm:$0xff]  ;;  %v1934_v51 = vld [vmem:[%s3074_s13 + $0x8] sm:$0xff] }
 0x430   : > { %2509 = vmatpush3.bf16.msra.mxu1 %v1537_v9 }
 0x431   : > { %1547 = vst.msk [vmem:[#allocation5] sm:$0x1] %vm3265_vm4, %v1546_v41  ;;  %v1831_v25 = vadd.f32 %v2757_v8, %v1830_v10  ;;  %2510 = vmatprep.subr.bf16.mxu1 %v2924_v0  ;;  %v1935_v8 = vld [vmem:[%s3074_s13 + $0x10] sm:$0xff] }
 0x433   : > { %v1832_v61 = vadd.f32 %v2759_v24, %v1831_v25  ;;  %v2767_v42 = vpop.eup %2766  ;;  %v1936_v24 = vld [vmem:[%s3074_s13 + $0x18] sm:$0xff] }
 0x434   : > { %v2769_v32 = vpop.eup %2768  ;;  %2511 = vmatpush3.bf16.msra.mxu1 %v1536_v48 }
 0x435   : > { %v1833_v7 = vadd.f32 %v2761_v31, %v1832_v61  ;;  %2542 = vmatprep.subr.bf16.mxu1 %v2924_v0  ;;  %v2771_v2 = vpop.eup %2770  ;;  %v1851_v26 = vpack.c.bf16 %v2769_v32, %v2767_v42  ;;  %v1937_v61 = vld [vmem:[%s3074_s13 + $0x20] sm:$0xff] }
 0x436   : > { %v2773_v54 = vpop.eup %2772 }
 0x437   : > { %v1834_v1 = vadd.f32 %v2767_v42, %v1833_v7  ;;  %2513 = vmatmul.mubr.bf16.vlgmr.msra.gmra.mxu1 %v503_v6  ;;  %v1852_v4 = vpack.c.bf16 %v2773_v54, %v2771_v2  ;;  %v1938_v7 = vld [vmem:[%s3074_s13 + $0x28] sm:$0xff] }
 0x438   : > { %2543 = vmatpush3.bf16.msra.mxu1 %v1853_v19  ;;  %2558 = vmatprep.mubr.msk.bf16.mxu1 %vm2926_vm3, %v2924_v0 }
 0x439   : > { %v1835_v53 = vadd.f32 %v2769_v32, %v1834_v1  ;;  %2544 = vmatprep.subr.bf16.mxu1 %v2924_v0  ;;  %v1939_v32 = vld [vmem:[%s3074_s13 + $0x30] sm:$0xff] }
 0x43b   : > { %v1836_v44 = vadd.f32 %v2771_v2, %v1835_v53  ;;  %v1940_v53 = vld [vmem:[%s3074_s13 + $0x38] sm:$0xff]  ;;  %s2927_s13 = smov [#allocation11]  }
 0x43c   : > { %2545 = vmatpush3.bf16.msra.mxu1 %v1852_v4  ;;  %s2836_s27 = sshll.u32 %s2927_s13, 4  ;;  %s2837_s27 = int_to_ptr.vmem [resolvable:$false] %s2836_s27 }
 0x43d   : > { %v1837_v40 = vadd.f32 %v2773_v54, %v1836_v44  ;;  %2546 = vmatprep.subr.bf16.mxu1 %v2924_v0  ;;  %s2838_s29 = scalar_lea.vmem %s2837_s27, 2048  ;;  %p2839_p5 = scmp.lt.s32.totalorder %s3824_s26, %s2837_s27 }
 0x43e   : > { %p2840_p6 = scmp.lt.s32.totalorder %s2838_s29, %s2832_s21 }
 0x43f   : > { %v1838_v60 = vadd.f32 %v2763_v18, %v1837_v40 }
 0x440   : > { %2547 = vmatpush3.bf16.msra.mxu1 %v1851_v26  ;;  %p2841_p4 = por %p2840_p6, %p2839_p5 }
 0x441   : > { %v1839_v48 = vadd.f32 %v2765_v22, %v1838_v60  ;;  %2548 = vmatprep.subr.bf16.mxu1 %v2924_v0 }
 0x442   : > { %p2842_p7 = pnand %p2841_p4, %p2835_p2 }
 0x443   : > { %v1840_v55 = vrot.slane %v1839_v48, 4 }
 0x444   : > { %2549 = vmatpush3.bf16.msra.mxu1 %v1850_v63 }
 0x445   : > { %v1841_v43 = vadd.f32 %v1840_v55, %v1839_v48  ;;  %2550 = vmatprep.subr.bf16.mxu1 %v2924_v0 }
 0x447   : > { %v1842_v49 = vrot.slane %v1841_v43, 2 }
 0x448   : > { %2551 = vmatpush3.bf16.msra.mxu1 %v1849_v35 }
 0x449   : > { %v1843_v13 = vadd.f32 %v1842_v49, %v1841_v43  ;;  %2552 = vmatprep.subr.bf16.mxu1 %v2924_v0 }
 0x44b   : > { %v1844_v33 = vrot.slane %v1843_v13, 1 }
 0x44c   : > { %2553 = vmatpush3.bf16.msra.mxu1 %v1848_v20 }
 0x44d   : > { %v1845_v5 = vadd.f32 %v1844_v33, %v1843_v13  ;;  %2554 = vmatprep.subr.bf16.mxu1 %v2924_v0 }
 0x44f   : > { %v1856_v27 = vadd.f32 %v1855_v52, %v1845_v5 }
 0x450   : > { %2555 = vmatpush3.bf16.msra.mxu1 %v1847_v46 }
 0x451   : > { %1857 = vst.msk [vmem:[#allocation5 + $0x1] sm:$0x1] %vm3265_vm4, %v1856_v27  ;;  %2556 = vmatprep.subr.bf16.mxu1 %v2924_v0 }
 0x454   : > { %2557 = vmatpush3.bf16.msra.mxu1 %v1846_v23 }
 0x457   : > { %2559 = vmatmul.mubr.bf16.vlgmr.msra.gmra.mxu1 %v503_v6 }
 0x458   : > { %v1912_v15 = vld [vmem:[#allocation5] sm:$0x3] }
 0x459   : > { %2774 = vrcp.f32 %v1912_v15 }
 0x466   : > { %v2775_v28 = vpop.eup %2774 }
 0x467   : > { %v1924_v17 = vrot.slane %v2775_v28, %v1923_v38  ;;  %v1920_v36 = vrot.slane %v2775_v28, %v3262_v34  ;;  %v1930_v34 = vld [vmem:[%s3881_s4 + $0x8] sm:$0xff] }
 0x4f7   : > { %v1590_v58 = vpop.f32.mrf.mxu1 }
 0x4f8   : > { %v1596_v3 = vadd.f32 %v1590_v58, %v3708_v50  ;;  %v1931_v50 = vld [vmem:[%s3881_s4 + $0x10] sm:$0xff] }
 0x4f9   : > { %v2514_v30 = vpop.f32.mrf.mxu1 }
 0x4fa   : > { %v1927_v39 = vmul.f32 %v1920_v36, %v1596_v3 }
 0x4fb   : > { %v1593_v29 = vpop.f32.mrf.mxu1 }
 0x4fd   : > { %v2515_v62 = vpop.f32.mrf.mxu1 }
 0x517   : > { %v1900_v37 = vpop.f32.mrf.mxu1 }
 0x518   : > { %v1906_v47 = vadd.f32 %v1900_v37, %v3724_v14  ;;  %v1932_v14 = vld [vmem:[%s3881_s4 + $0x18] sm:$0xff] }
 0x519   : > { %v2560_v45 = vpop.f32.mrf.mxu1 }
 0x51a   : > { %v1928_v11 = vmul.f32 %v1924_v17, %v1906_v47 }
 0x51b   : > { %v1903_v12 = vpop.f32.mrf.mxu1 }
 0x51c   : > { %1983 = vmatprep.subr.mxu0 %v1928_v11 }
 0x51d   : > { %v2561_v21 = vpop.f32.mrf.mxu1  ;;  %1984 = vmatpush1.msra.mxu0 %v1927_v39 }
 0x51e   : > { %2262 = vmatmul.mubr.msk.f32.vlgmr.msra.gmra.mxu0 %vm537_vm1, %v1929_v59 }
 0x51f   : > { %2023 = vmatprep.mubr.f32.mxu0 %v2924_v0 }
 0x522   : > { %2263 = vmatmul.mubr.msk.f32.gmra.mxu0 %vm537_vm1, %v1930_v34 }
 0x523   : > { %2029 = vmatprep.mubr.f32.mxu0 %v2924_v0 }
 0x526   : > { %2264 = vmatmul.mubr.msk.f32.gmra.mxu0 %vm537_vm1, %v1931_v50 }
 0x527   : > { %2035 = vmatprep.mubr.f32.mxu0 %v2924_v0 }
 0x52a   : > { %2265 = vmatmul.mubr.msk.f32.gmra.mxu0 %vm537_vm1, %v1932_v14 }
 0x5de   : > { %v2019_v41 = vpop.f32.mrf.mxu0 }
 0x5df   : > { %v2020_v16 = vadd.f32 %v2019_v41, %v1933_v57 }
 0x5e0   : > { %v2021_v10 = vpop.f32.mrf.mxu0 }
 0x5e1   : > { %2042 = vst [vmem:[%s311_s0] sm:$0xff] %v2020_v16  ;;  %v2022_v25 = vadd.f32 %v2021_v10, %v1934_v51 }
 0x5e2   : > { %v2025_v0 = vpop.f32.mrf.mxu0 }
 0x5e3   : > { %2043 = vst [vmem:[%s311_s0 + $0x8] sm:$0xff] %v2022_v25  ;;  %v2026_v9 = vadd.f32 %v2025_v0, %v1935_v8 }
 0x5e4   : > { %v2027_v31 = vpop.f32.mrf.mxu0 }
 0x5e5   : > { %2044 = vst [vmem:[%s311_s0 + $0x10] sm:$0xff] %v2026_v9  ;;  %v2028_v18 = vadd.f32 %v2027_v31, %v1936_v24 }
 0x5e6   : > { %v2031_v22 = vpop.f32.mrf.mxu0 }
 0x5e7   : > { %2045 = vst [vmem:[%s311_s0 + $0x18] sm:$0xff] %v2028_v18  ;;  %v2032_v42 = vadd.f32 %v2031_v22, %v1937_v61 }
 0x5e8   : > { %v2033_v1 = vpop.f32.mrf.mxu0 }
 0x5e9   : > { %2046 = vst [vmem:[%s311_s0 + $0x20] sm:$0xff] %v2032_v42  ;;  %v2034_v19 = vadd.f32 %v2033_v1, %v1938_v7 }
 0x5ea   : > { %v2037_v6 = vpop.f32.mrf.mxu0 }
 0x5eb   : > { %2047 = vst [vmem:[%s311_s0 + $0x28] sm:$0xff] %v2034_v19  ;;  %v2038_v2 = vadd.f32 %v2037_v6, %v1939_v32 }
 0x5ec   : > { %v2039_v54 = vpop.f32.mrf.mxu0 }
 0x5ed   : > { %2048 = vst [vmem:[%s311_s0 + $0x30] sm:$0xff] %v2038_v2  ;;  %v2040_v44 = vadd.f32 %v2039_v54, %v1940_v53 }
 0x5ef   : > { %2049 = vst [vmem:[%s311_s0 + $0x38] sm:$0xff] %v2040_v44 }
 0x5f0   : > { %2845 = shalt.err (!%p2842_p7)
}
 0x5f1   : > { %s2846_s28 = scalar_lea.hbm %s3829_s15, 1024  ;;  %s2850_s24 = scalar_lea.hbm %s3882_s5, 2048 }
 0x5f2   : > { %p2847_p1 = scmp.ne.s32.totalorder %s3829_s15, %s2846_s28  ;;  %p2851_p3 = scmp.lt.s32.totalorder %s3829_s15, %s3882_s5 }
 0x5f3   : > { %p2852_p8 = scmp.lt.s32.totalorder %s2850_s24, %s2846_s28 }
 0x5f4   : > { %p2848_p10 = pnand %p2847_p1, %p3011_p9 }
 0x5f5   : > { %p2853_p0 = por %p2852_p8, %p2851_p3 }
 0x5f6   : > { %p2849_p13 = pneg %p2848_p10 }
 0x5f8   : > { %p2854_p2 = pnand %p2853_p0, %p2849_p13 }
 0x5fa   : > { %2857 = shalt.err (!%p2854_p2)
}
 0x5fb   : > { %s2928_s7 = smov 256   ;;  %s2929_s0 = smov 16  }
 0x5fc   : > { %2566 = dma.vmem_to_hbm [thread:$0]  (%p3011_p9), %s3824_s26, 1024, %s3829_s15, %s2051_s25, %s2928_s7, %s2928_s7, %s2929_s0  }
 0x5fd PF: > { %s2081_s12 = sand.u32 1, %s2896_s18   ;;  %p2576_p5 = pnand %p2185_p12, %p3018_p11 }
 0x5fe   : > { %s2082_s17 = scalar_lea.sflag [#allocation8], %s2081_s12 }
 0x5ff   : > { %p2577_p6 = pneg %p2576_p5 }
 0x601   : > { %2891 = dma.done.wait (%p2577_p6), %s2082_s17, 1024  }
 0x602   : > { %2893 = vsyncadd (%p2577_p6), %s2082_s17, 4294966272  ;;  %s24_s23 = sadd.s32 1, %s2916_s23   ;;  %s3896_s6 = sld [smem:[#allocation16_spill]] }
 0x603   : > { %p21_p4 = scmp.ge.s32.totalorder %s24_s23, 4   ;;  %s3897_s9 = sld [smem:[#allocation15_spill]] }
 0x604   : > { %s3898_s18 = smov %s2900_s19  ;;  %s3899_s19 = smov %s2904_s20 }
 0x605   : > { %s3901_s21 = smov %s2912_s22  ;;  %23 = sbr.rel (!%p21_p4) target bundleno = 10 (0xa), region = 106 }
 0x608   : > { %s3900_s20 = smov %s3896_s6 }
 0x609   : > { %s3902_s22 = smov %s3897_s9 }
 0x60a   :  { %2087 = vsyncpa [#allocation7], 1 }
 0x60b   :  { %2089 = vsyncpa [#allocation7 + $0x1], 1 }
 0x60c   :  { %2090 = vsyncpa [#allocation10], 1 }
 0x60d   :  { %2092 = vsyncpa [#allocation10 + $0x1], 1 }
 0x60e   :  { %2093 = vsyncpa [#allocation8], 1 }
 0x60f   :  { %2095 = vsyncpa [#allocation8 + $0x1], 1 }

</bundles_post_ra>
